<compile_context>
chip_gen: v6e
topology: v6e:2x2x1
jax: 0.10.0
libtpu: 0.0.40
codegen_flags: <defaults>
</compile_context>

<pallas_src>
import functools

import jax
import jax.numpy as jnp
from jax import lax
from jax.experimental import pallas as pl
from jax.experimental.pallas import tpu as pltpu

EPS = 1e-5                      # PyTorch BatchNorm2d default
TN = 128                        # lane-dense channel (MXU N) tile
ROW_TILE = 512                  # target rows per tile
VMEM_LIMIT = 32 * 1024 * 1024   # scoped-VMEM budget (safe on v5e/v6e/v7x)


# ----------------------------- Pallas kernels ------------------------------

def conv_stats_kernel(*refs, fused, rows_true, tile_rows):
    """One (row-tile, N-tile) block of patches @ weights on the MXU (bf16 in,
    f32 accumulation) plus this tile's per-channel partial sum / sum-of-squares
    for BatchNorm.  With `fused`, BN1's folded scale/shift + ReLU is applied
    per patch column to the raw conv1 output before the matmul."""
    if fused:
        p_ref, w_ref, cs_ref, cb_ref, y_ref, sum_ref, sq_ref = refs
        p = jnp.maximum(p_ref[...].astype(jnp.float32) * cs_ref[...] + cb_ref[...], 0.0)
        p = p.astype(jnp.bfloat16)
    else:
        p_ref, w_ref, y_ref, sum_ref, sq_ref = refs
        p = p_ref[...]

    y = jnp.dot(p, w_ref[...], preferred_element_type=jnp.float32)
    y_ref[...] = y.astype(y_ref.dtype)                 # bf16 writeback

    ys = y
    if rows_true is not None:    # mask padded rows out of the BN statistics
        gid = pl.program_id(0) * tile_rows + lax.broadcasted_iota(jnp.int32, y.shape, 0)
        ys = jnp.where(gid < rows_true, y, 0.0)

    s = jnp.sum(ys, axis=0, keepdims=True)             # (1, TN) f32
    q = jnp.sum(ys * ys, axis=0, keepdims=True)
    # Each grid step owns its own sublane-aligned (8, TN) partial-stats block
    # (no resident accumulator -> all grid axes stay "parallel"): row 0 holds
    # the tile sum, rows 1..7 are zeros that vanish in the host-side reduce.
    row = lax.broadcasted_iota(jnp.int32, sum_ref.shape, 0)
    sum_ref[...] = jnp.where(row == 0, s, 0.0)
    sq_ref[...] = jnp.where(row == 0, q, 0.0)


def tail_kernel(y2_ref, sc_ref, s2_ref, b2_ref, ss_ref, bs_ref, o_ref):
    """BN(conv2) + BN(shortcut) (identity path uses scale=1, shift=0),
    residual add, ReLU — one fused elementwise pass."""
    bn2 = y2_ref[...].astype(jnp.float32) * s2_ref[...] + b2_ref[...]
    sc = sc_ref[...].astype(jnp.float32) * ss_ref[...] + bs_ref[...]
    o_ref[...] = jnp.maximum(bn2 + sc, 0.0).astype(o_ref.dtype)


# ----------------------------- pallas_call glue -----------------------------

def conv_matmul_stats(patches, w_pad, tile_rows, rows_true,
                      colscale=None, colshift=None):
    """patches: (rows_pad, K) bf16, w_pad: (K, Npad) bf16  ->
       y (rows_pad, Npad) bf16, per-tile partial sum / sumsq (nr*8, Npad) f32."""
    rows_pad, k = patches.shape
    npad = w_pad.shape[1]
    nr, nn = rows_pad // tile_rows, npad // TN
    fused = colscale is not None

    kernel = functools.partial(
        conv_stats_kernel, fused=fused, tile_rows=tile_rows,
        rows_true=rows_true if rows_true != rows_pad else None)

    in_specs = [pl.BlockSpec((tile_rows, k), lambda i, j: (i, 0)),
                pl.BlockSpec((k, TN), lambda i, j: (0, j))]
    args = [patches, w_pad]
    if fused:
        in_specs += [pl.BlockSpec((1, k), lambda i, j: (0, 0)),
                     pl.BlockSpec((1, k), lambda i, j: (0, 0))]
        args += [colscale, colshift]

    return pl.pallas_call(
        kernel,
        grid=(nr, nn),
        in_specs=in_specs,
        out_specs=(pl.BlockSpec((tile_rows, TN), lambda i, j: (i, j)),
                   pl.BlockSpec((8, TN), lambda i, j: (i, j)),
                   pl.BlockSpec((8, TN), lambda i, j: (i, j))),
        out_shape=(jax.ShapeDtypeStruct((rows_pad, npad), jnp.bfloat16),
                   jax.ShapeDtypeStruct((nr * 8, npad), jnp.float32),
                   jax.ShapeDtypeStruct((nr * 8, npad), jnp.float32)),
        compiler_params=pltpu.CompilerParams(
            dimension_semantics=("parallel", "parallel"),
            vmem_limit_bytes=VMEM_LIMIT),
    )(*args)


def tail_apply(y2, shortcut, s2, b2, ss, bs, tile_rows):
    rows_pad, npad = y2.shape
    big = pl.BlockSpec((tile_rows, npad), lambda i: (i, 0))
    vec = pl.BlockSpec((1, npad), lambda i: (0, 0))
    return pl.pallas_call(
        tail_kernel,
        grid=(rows_pad // tile_rows,),
        in_specs=[big, big, vec, vec, vec, vec],
        out_specs=big,
        out_shape=jax.ShapeDtypeStruct((rows_pad, npad), jnp.bfloat16),
        compiler_params=pltpu.CompilerParams(
            dimension_semantics=("parallel",),
            vmem_limit_bytes=VMEM_LIMIT),
    )(y2, shortcut, s2, b2, ss, bs)


# ----------------------------- host-side helpers ----------------------------

def _round_up(x, m):
    return ((x + m - 1) // m) * m


def _pad_last(a, n):
    pad = n - a.shape[-1]
    return a if pad == 0 else jnp.pad(a, ((0, 0),) * (a.ndim - 1) + ((0, pad),))


def _pad_rows(a, n):
    pad = n - a.shape[0]
    return a if pad == 0 else jnp.pad(a, ((0, pad),) + ((0, 0),) * (a.ndim - 1))


def _row_tiling(rows):
    tile = ROW_TILE if rows >= ROW_TILE else _round_up(rows, 8)
    return tile, _round_up(rows, tile)


def _bn_scale_shift(psum, psq, n, gamma, beta):
    """Fold training-mode BN (biased batch variance, eps=1e-5) into y*scale+shift.
    psum/psq: (nr*8, Npad) per-tile partials from the conv pass."""
    s = jnp.sum(psum, axis=0)
    q = jnp.sum(psq, axis=0)
    mean = s / n
    var = jnp.maximum(q / n - mean * mean, 0.0)
    scale = gamma * lax.rsqrt(var + EPS)
    shift = beta - mean * scale
    return scale, shift


def im2col(x, ksize, stride, pad):
    """x: (B,H,W,C) NHWC -> (B*Ho*Wo, ksize*ksize*C) patch matrix.
    Column order is (ky, kx, cin), matching the HWIO weight reshape."""
    if pad:
        x = jnp.pad(x, ((0, 0), (pad, pad), (pad, pad), (0, 0)))
    B, Hp, Wp, C = x.shape
    Ho = (Hp - ksize) // stride + 1
    Wo = (Wp - ksize) // stride + 1
    cols = []
    for ky in range(ksize):
        for kx in range(ksize):
            cols.append(x[:, ky:ky + Ho * stride:stride, kx:kx + Wo * stride:stride, :])
    patches = jnp.concatenate(cols, axis=-1)
    return patches.reshape(B * Ho * Wo, ksize * ksize * C), (B, Ho, Wo)


def resblk_forward(x_nchw, params, ch_in, ch_out, stride=1):
    """Pallas implementation of ResBlk.forward. Input/output are NCHW float32."""
    x = jnp.transpose(x_nchw, (0, 2, 3, 1)).astype(jnp.bfloat16)   # NHWC, bf16
    has_extra = (ch_in != ch_out) or (stride != 1)
    npad = _round_up(ch_out, TN)

    # ---- conv_stack1: 3x3 / stride / pad 1 -> conv + BN stats ---------------
    p1, (B, Ho, Wo) = im2col(x, 3, stride, 1)
    rows = B * Ho * Wo
    tile_rows, rows_pad = _row_tiling(rows)
    p1 = _pad_rows(p1, rows_pad)
    w1 = _pad_last(params["w1"].reshape(9 * ch_in, ch_out), npad).astype(jnp.bfloat16)
    g1 = _pad_last(params["g1"][None], npad)[0]
    b1 = _pad_last(params["b1"][None], npad)[0]
    y1, s1, q1 = conv_matmul_stats(p1, w1, tile_rows, rows)
    scale1, shift1 = _bn_scale_shift(s1, q1, rows, g1, b1)

    # ---- conv_stack2: 3x3 / stride 1 / pad 1 on relu(bn1(y1)) ---------------
    # BN1 + ReLU are fused into the conv2 kernel.  The zero padding of conv2's
    # post-activation input is emulated by padding the raw y1 image with
    # -shift/scale so relu(scale*pad + shift) == 0 in-kernel.
    sc_c, sh_c = scale1[:ch_out], shift1[:ch_out]
    safe = jnp.where(sc_c != 0, sc_c, 1.0)
    padval = jnp.where(sc_c != 0, -sh_c / safe, 0.0).astype(jnp.bfloat16)
    # TODO(synk): a gamma==0 channel would make this emulated padding inexact.
    y1_img = y1[:rows, :ch_out].reshape(B, Ho, Wo, ch_out)
    bg = jnp.broadcast_to(padval, (B, Ho + 2, Wo + 2, ch_out))
    p2, _ = im2col(lax.dynamic_update_slice(bg, y1_img, (0, 1, 1, 0)), 3, 1, 0)
    if rows_pad != rows:   # padded rows must also map to 0 after the fused act
        rowbg = jnp.broadcast_to(jnp.tile(padval, 9), (rows_pad, 9 * ch_out))
        p2 = lax.dynamic_update_slice(rowbg, p2, (0, 0))
    colscale = jnp.tile(sc_c, 9)[None, :].astype(jnp.float32)
    colshift = jnp.tile(sh_c, 9)[None, :].astype(jnp.float32)
    w2 = _pad_last(params["w2"].reshape(9 * ch_out, ch_out), npad).astype(jnp.bfloat16)
    g2 = _pad_last(params["g2"][None], npad)[0]
    b2 = _pad_last(params["b2"][None], npad)[0]
    y2, s2, q2 = conv_matmul_stats(p2, w2, tile_rows, rows,
                                   colscale=colscale, colshift=colshift)
    scale2, shift2 = _bn_scale_shift(s2, q2, rows, g2, b2)

    # ---- shortcut -------------------------------------------------------------
    if has_extra:                                  # 1x1 conv / stride + BN
        psc, _ = im2col(x, 1, stride, 0)
        psc = _pad_rows(psc, rows_pad)
        ws = _pad_last(params["ws"].reshape(ch_in, ch_out), npad).astype(jnp.bfloat16)
        gs = _pad_last(params["gs"][None], npad)[0]
        bs = _pad_last(params["bs"][None], npad)[0]
        shortcut, ss, qs = conv_matmul_stats(psc, ws, tile_rows, rows)
        scale_s, shift_s = _bn_scale_shift(ss, qs, rows, gs, bs)
    else:                                          # identity: ch_in==ch_out, stride==1
        shortcut = _pad_rows(_pad_last(x.reshape(rows, ch_in), npad), rows_pad)
        scale_s = jnp.ones((npad,), jnp.float32)
        shift_s = jnp.zeros((npad,), jnp.float32)

    # ---- BN2 + BN_shortcut + add + ReLU (single fused elementwise pass) -----
    out = tail_apply(y2, shortcut, scale2[None], shift2[None],
                     scale_s[None], shift_s[None], tile_rows)
    out = out[:rows, :ch_out].reshape(B, Ho, Wo, ch_out)
    return jnp.transpose(out, (0, 3, 1, 2)).astype(jnp.float32)    # NCHW f32


# ----------------------------- reference (pure JAX) --------------------------

def ref_resblk(x, params, ch_in, ch_out, stride):
    def conv(v, w, s, p):
        return lax.conv_general_dilated(
            v, w, (s, s), [(p, p), (p, p)],
            dimension_numbers=("NCHW", "HWIO", "NCHW"),
            precision=lax.Precision.HIGHEST)

    def bn(y, g, b):
        m = jnp.mean(y, axis=(0, 2, 3), keepdims=True)
        v = jnp.mean((y - m) ** 2, axis=(0, 2, 3), keepdims=True)
        return (y - m) * lax.rsqrt(v + EPS) * g.reshape(1, -1, 1, 1) + b.reshape(1, -1, 1, 1)

    out = jax.nn.relu(bn(conv(x, params["w1"], stride, 1), params["g1"], params["b1"]))
    out = bn(conv(out, params["w2"], 1, 1), params["g2"], params["b2"])
    if ch_in != ch_out or stride != 1:
        sc = bn(conv(x, params["ws"], stride, 0), params["gs"], params["bs"])
    else:
        sc = x
    return jax.nn.relu(sc + out)


def make_params(key, ch_in, ch_out):
    k = jax.random.split(key, 9)
    return {
        "w1": 0.1 * jax.random.normal(k[0], (3, 3, ch_in, ch_out), jnp.float32),
        "g1": 1.0 + 0.1 * jax.random.normal(k[1], (ch_out,), jnp.float32),
        "b1": 0.1 * jax.random.normal(k[2], (ch_out,), jnp.float32),
        "w2": 0.1 * jax.random.normal(k[3], (3, 3, ch_out, ch_out), jnp.float32),
        "g2": 1.0 + 0.1 * jax.random.normal(k[4], (ch_out,), jnp.float32),
        "b2": 0.1 * jax.random.normal(k[5], (ch_out,), jnp.float32),
        "ws": 0.1 * jax.random.normal(k[6], (1, 1, ch_in, ch_out), jnp.float32),
        "gs": 1.0 + 0.1 * jax.random.normal(k[7], (ch_out,), jnp.float32),
        "bs": 0.1 * jax.random.normal(k[8], (ch_out,), jnp.float32),
    }


if __name__ == "__main__":
    key = jax.random.PRNGKey(0)
    kp1, kp2, kx1, kx2 = jax.random.split(key, 4)

    fwd = jax.jit(resblk_forward, static_argnums=(2, 3, 4))

    # Tolerance: the whole activation pipeline is bf16 (bf16 MXU inputs, bf16
    # intermediate/output writebacks, f32 accumulation and BN statistics) vs an
    # f32 HIGHEST reference; ~4-5 compounded bf16 roundings through two convs
    # and BN normalization bound the deviation well below 5e-2, while genuine
    # structural/layout errors would be O(0.1-1).
    ATOL = RTOL = 5e-2

    # Case 1: downsampling block with the `extra` (1x1 conv + BN) shortcut.
    B, CH_IN, CH_OUT, H, W, STRIDE = 2, 4, 8, 16, 16, 2
    params1 = make_params(kp1, CH_IN, CH_OUT)
    x1 = jax.random.normal(kx1, (B, CH_IN, H, W), jnp.float32)
    out1 = jax.block_until_ready(fwd(x1, params1, CH_IN, CH_OUT, STRIDE))
    ref1 = ref_resblk(x1, params1, CH_IN, CH_OUT, STRIDE)
    assert out1.shape == (B, CH_OUT, H // STRIDE, W // STRIDE), out1.shape
    assert jnp.allclose(out1, ref1, atol=ATOL, rtol=RTOL), \
        float(jnp.max(jnp.abs(out1 - ref1)))

    # Case 2: identity-shortcut block (ch_in == ch_out, stride == 1).
    CH = 8
    params2 = make_params(kp2, CH, CH)
    x2 = jax.random.normal(kx2, (B, CH, H, W), jnp.float32)
    out2 = jax.block_until_ready(fwd(x2, params2, CH, CH, 1))
    ref2 = ref_resblk(x2, params2, CH, CH, 1)
    assert out2.shape == (B, CH, H, W), out2.shape
    assert jnp.allclose(out2, ref2, atol=ATOL, rtol=RTOL), \
        float(jnp.max(jnp.abs(out2 - ref2)))

    print("KERNEL_OK")
</pallas_src>

<mosaic_0001>
module attributes {stable_mosaic.version = 11 : i64} {
  func.func @conv_stats_kernel(%arg0: i32, %arg1: i32, %arg2: memref<128x36xbf16, #tpu.memory_space<vmem>>, %arg3: memref<36x128xbf16, #tpu.memory_space<vmem>>, %arg4: memref<128x128xbf16, #tpu.memory_space<vmem>>, %arg5: memref<8x128xf32, #tpu.memory_space<vmem>>, %arg6: memref<8x128xf32, #tpu.memory_space<vmem>>) attributes {dimension_semantics = [#tpu.dimension_semantics<parallel>, #tpu.dimension_semantics<parallel>], iteration_bounds = array<i64: 1, 1>, scalar_prefetch = 0 : i64, scratch_operands = 0 : i64, tpu.core_type = #tpu.core_type<tc>, window_params = [{transform_indices = @transform_0, window_bounds = array<i64: 128, 36>}, {transform_indices = @transform_1, window_bounds = array<i64: 36, 128>}, {transform_indices = @transform_2, window_bounds = array<i64: 128, 128>}, {transform_indices = @transform_3, window_bounds = array<i64: 8, 128>}, {transform_indices = @transform_4, window_bounds = array<i64: 8, 128>}]} {
    %c0 = arith.constant 0 : index
    %c0_0 = arith.constant 0 : index
    %0 = vector.load %arg2[%c0, %c0_0] : memref<128x36xbf16, #tpu.memory_space<vmem>>, vector<128x36xbf16>
    %c0_1 = arith.constant 0 : index
    %c0_2 = arith.constant 0 : index
    %1 = vector.load %arg3[%c0_1, %c0_2] : memref<36x128xbf16, #tpu.memory_space<vmem>>, vector<36x128xbf16>
    %cst = arith.constant dense<0.000000e+00> : vector<128x128xf32>
    %2 = tpu.matmul %0, %1, %cst {dimension_numbers = #tpu.dot_dimension_numbers<[1], [0], [0], [1], [0, 0, 1, 1], [], []>} : vector<128x36xbf16>, vector<36x128xbf16>, vector<128x128xf32> -> vector<128x128xf32>
    %3 = arith.truncf %2 : vector<128x128xf32> to vector<128x128xbf16>
    %c0_3 = arith.constant 0 : index
    %c0_4 = arith.constant 0 : index
    %4 = vector.load %arg4[%c0_3, %c0_4] : memref<128x128xbf16, #tpu.memory_space<vmem>>, vector<128x128xbf16>
    tpu.vector_store %arg4[%c0_3, %c0_4], %3 {strides = array<i32>} : memref<128x128xbf16, #tpu.memory_space<vmem>>, vector<128x128xbf16>,
    %cst_5 = arith.constant dense<0.000000e+00> : vector<128xf32>
    %5 = vector.multi_reduction <add>, %2, %cst_5 [0] : vector<128x128xf32> to vector<128xf32>
    %6 = vector.shape_cast %5 : vector<128xf32> to vector<1x128xf32>
    %7 = arith.mulf %2, %2 : vector<128x128xf32>
    %cst_6 = arith.constant dense<0.000000e+00> : vector<128xf32>
    %8 = vector.multi_reduction <add>, %7, %cst_6 [0] : vector<128x128xf32> to vector<128xf32>
    %9 = vector.shape_cast %8 : vector<128xf32> to vector<1x128xf32>
    %10 = tpu.iota {dimensions = array<i32: 0>} : vector<8x128xi32>
    %c0_i32 = arith.constant 0 : i32
    %11 = vector.broadcast %c0_i32 : i32 to vector<8x128xi32>
    %12 = arith.cmpi eq, %10, %11 : vector<8x128xi32>
    %cst_7 = arith.constant 0.000000e+00 : f32
    %13 = vector.shape_cast %6 : vector<1x128xf32> to vector<1x128xf32>
    %14 = vector.broadcast %13 : vector<1x128xf32> to vector<8x128xf32>
    %15 = vector.broadcast %cst_7 : f32 to vector<8x128xf32>
    %16 = arith.select %12, %14, %15 : vector<8x128xi1>, vector<8x128xf32>
    %c0_8 = arith.constant 0 : index
    %c0_9 = arith.constant 0 : index
    %17 = vector.load %arg5[%c0_8, %c0_9] : memref<8x128xf32, #tpu.memory_space<vmem>>, vector<8x128xf32>
    tpu.vector_store %arg5[%c0_8, %c0_9], %16 {strides = array<i32>} : memref<8x128xf32, #tpu.memory_space<vmem>>, vector<8x128xf32>,
    %c0_i32_10 = arith.constant 0 : i32
    %18 = vector.broadcast %c0_i32_10 : i32 to vector<8x128xi32>
    %19 = arith.cmpi eq, %10, %18 : vector<8x128xi32>
    %cst_11 = arith.constant 0.000000e+00 : f32
    %20 = vector.shape_cast %9 : vector<1x128xf32> to vector<1x128xf32>
    %21 = vector.broadcast %20 : vector<1x128xf32> to vector<8x128xf32>
    %22 = vector.broadcast %cst_11 : f32 to vector<8x128xf32>
    %23 = arith.select %19, %21, %22 : vector<8x128xi1>, vector<8x128xf32>
    %c0_12 = arith.constant 0 : index
    %c0_13 = arith.constant 0 : index
    %24 = vector.load %arg6[%c0_12, %c0_13] : memref<8x128xf32, #tpu.memory_space<vmem>>, vector<8x128xf32>
    tpu.vector_store %arg6[%c0_12, %c0_13], %23 {strides = array<i32>} : memref<8x128xf32, #tpu.memory_space<vmem>>, vector<8x128xf32>,
    return
  }
  func.func @transform_0(%arg0: i32, %arg1: i32) -> (i32, i32) {
    %c0_i32 = arith.constant 0 : i32
    %c0_i32_0 = arith.constant 0 : i32
    return %arg0, %c0_i32 : i32, i32
  }
  func.func @transform_1(%arg0: i32, %arg1: i32) -> (i32, i32) {
    %c0_i32 = arith.constant 0 : i32
    %c0_i32_0 = arith.constant 0 : i32
    return %c0_i32, %arg1 : i32, i32
  }
  func.func @transform_2(%arg0: i32, %arg1: i32) -> (i32, i32) {
    %c0_i32 = arith.constant 0 : i32
    return %arg0, %arg1 : i32, i32
  }
  func.func @transform_3(%arg0: i32, %arg1: i32) -> (i32, i32) {
    %c0_i32 = arith.constant 0 : i32
    return %arg0, %arg1 : i32, i32
  }
  func.func @transform_4(%arg0: i32, %arg1: i32) -> (i32, i32) {
    %c0_i32 = arith.constant 0 : i32
    return %arg0, %arg1 : i32, i32
  }
}

module attributes {stable_mosaic.version = 11 : i64} {
  func.func @conv_stats_kernel(%arg0: i32, %arg1: i32, %arg2: memref<128x72xbf16, #tpu.memory_space<vmem>>, %arg3: memref<72x128xbf16, #tpu.memory_space<vmem>>, %arg4: memref<1x72xf32, #tpu.memory_space<vmem>>, %arg5: memref<1x72xf32, #tpu.memory_space<vmem>>, %arg6: memref<128x128xbf16, #tpu.memory_space<vmem>>, %arg7: memref<8x128xf32, #tpu.memory_space<vmem>>, %arg8: memref<8x128xf32, #tpu.memory_space<vmem>>) attributes {dimension_semantics = [#tpu.dimension_semantics<parallel>, #tpu.dimension_semantics<parallel>], iteration_bounds = array<i64: 1, 1>, scalar_prefetch = 0 : i64, scratch_operands = 0 : i64, tpu.core_type = #tpu.core_type<tc>, window_params = [{transform_indices = @transform_0, window_bounds = array<i64: 128, 72>}, {transform_indices = @transform_1, window_bounds = array<i64: 72, 128>}, {pipeline_mode = #tpu.pipeline_mode<synchronous>, transform_indices = @transform_2, window_bounds = array<i64: 1, 72>}, {pipeline_mode = #tpu.pipeline_mode<synchronous>, transform_indices = @transform_3, window_bounds = array<i64: 1, 72>}, {transform_indices = @transform_4, window_bounds = array<i64: 128, 128>}, {transform_indices = @transform_5, window_bounds = array<i64: 8, 128>}, {transform_indices = @transform_6, window_bounds = array<i64: 8, 128>}]} {
    %c0 = arith.constant 0 : index
    %c0_0 = arith.constant 0 : index
    %0 = vector.load %arg2[%c0, %c0_0] : memref<128x72xbf16, #tpu.memory_space<vmem>>, vector<128x72xbf16>
    %1 = arith.extf %0 : vector<128x72xbf16> to vector<128x72xf32>
    %c0_1 = arith.constant 0 : index
    %c0_2 = arith.constant 0 : index
    %2 = vector.load %arg4[%c0_1, %c0_2] : memref<1x72xf32, #tpu.memory_space<vmem>>, vector<1x72xf32>
    %3 = vector.broadcast %2 : vector<1x72xf32> to vector<128x72xf32>
    %4 = arith.mulf %1, %3 : vector<128x72xf32>
    %c0_3 = arith.constant 0 : index
    %c0_4 = arith.constant 0 : index
    %5 = vector.load %arg5[%c0_3, %c0_4] : memref<1x72xf32, #tpu.memory_space<vmem>>, vector<1x72xf32>
    %6 = vector.broadcast %5 : vector<1x72xf32> to vector<128x72xf32>
    %7 = arith.addf %4, %6 : vector<128x72xf32>
    %cst = arith.constant 0.000000e+00 : f32
    %8 = vector.broadcast %cst : f32 to vector<128x72xf32>
    %9 = arith.maximumf %7, %8 : vector<128x72xf32>
    %10 = arith.truncf %9 : vector<128x72xf32> to vector<128x72xbf16>
    %c0_5 = arith.constant 0 : index
    %c0_6 = arith.constant 0 : index
    %11 = vector.load %arg3[%c0_5, %c0_6] : memref<72x128xbf16, #tpu.memory_space<vmem>>, vector<72x128xbf16>
    %cst_7 = arith.constant dense<0.000000e+00> : vector<128x128xf32>
    %12 = tpu.matmul %10, %11, %cst_7 {dimension_numbers = #tpu.dot_dimension_numbers<[1], [0], [0], [1], [0, 0, 1, 1], [], []>} : vector<128x72xbf16>, vector<72x128xbf16>, vector<128x128xf32> -> vector<128x128xf32>
    %13 = arith.truncf %12 : vector<128x128xf32> to vector<128x128xbf16>
    %c0_8 = arith.constant 0 : index
    %c0_9 = arith.constant 0 : index
    %14 = vector.load %arg6[%c0_8, %c0_9] : memref<128x128xbf16, #tpu.memory_space<vmem>>, vector<128x128xbf16>
    tpu.vector_store %arg6[%c0_8, %c0_9], %13 {strides = array<i32>} : memref<128x128xbf16, #tpu.memory_space<vmem>>, vector<128x128xbf16>,
    %cst_10 = arith.constant dense<0.000000e+00> : vector<128xf32>
    %15 = vector.multi_reduction <add>, %12, %cst_10 [0] : vector<128x128xf32> to vector<128xf32>
    %16 = vector.shape_cast %15 : vector<128xf32> to vector<1x128xf32>
    %17 = arith.mulf %12, %12 : vector<128x128xf32>
    %cst_11 = arith.constant dense<0.000000e+00> : vector<128xf32>
    %18 = vector.multi_reduction <add>, %17, %cst_11 [0] : vector<128x128xf32> to vector<128xf32>
    %19 = vector.shape_cast %18 : vector<128xf32> to vector<1x128xf32>
    %20 = tpu.iota {dimensions = array<i32: 0>} : vector<8x128xi32>
    %c0_i32 = arith.constant 0 : i32
    %21 = vector.broadcast %c0_i32 : i32 to vector<8x128xi32>
    %22 = arith.cmpi eq, %20, %21 : vector<8x128xi32>
    %cst_12 = arith.constant 0.000000e+00 : f32
    %23 = vector.shape_cast %16 : vector<1x128xf32> to vector<1x128xf32>
    %24 = vector.broadcast %23 : vector<1x128xf32> to vector<8x128xf32>
    %25 = vector.broadcast %cst_12 : f32 to vector<8x128xf32>
    %26 = arith.select %22, %24, %25 : vector<8x128xi1>, vector<8x128xf32>
    %c0_13 = arith.constant 0 : index
    %c0_14 = arith.constant 0 : index
    %27 = vector.load %arg7[%c0_13, %c0_14] : memref<8x128xf32, #tpu.memory_space<vmem>>, vector<8x128xf32>
    tpu.vector_store %arg7[%c0_13, %c0_14], %26 {strides = array<i32>} : memref<8x128xf32, #tpu.memory_space<vmem>>, vector<8x128xf32>,
    %c0_i32_15 = arith.constant 0 : i32
    %28 = vector.broadcast %c0_i32_15 : i32 to vector<8x128xi32>
    %29 = arith.cmpi eq, %20, %28 : vector<8x128xi32>
    %cst_16 = arith.constant 0.000000e+00 : f32
    %30 = vector.shape_cast %19 : vector<1x128xf32> to vector<1x128xf32>
    %31 = vector.broadcast %30 : vector<1x128xf32> to vector<8x128xf32>
    %32 = vector.broadcast %cst_16 : f32 to vector<8x128xf32>
    %33 = arith.select %29, %31, %32 : vector<8x128xi1>, vector<8x128xf32>
    %c0_17 = arith.constant 0 : index
    %c0_18 = arith.constant 0 : index
    %34 = vector.load %arg8[%c0_17, %c0_18] : memref<8x128xf32, #tpu.memory_space<vmem>>, vector<8x128xf32>
    tpu.vector_store %arg8[%c0_17, %c0_18], %33 {strides = array<i32>} : memref<8x128xf32, #tpu.memory_space<vmem>>, vector<8x128xf32>,
    return
  }
  func.func @transform_0(%arg0: i32, %arg1: i32) -> (i32, i32) {
    %c0_i32 = arith.constant 0 : i32
    %c0_i32_0 = arith.constant 0 : i32
    return %arg0, %c0_i32 : i32, i32
  }
  func.func @transform_1(%arg0: i32, %arg1: i32) -> (i32, i32) {
    %c0_i32 = arith.constant 0 : i32
    %c0_i32_0 = arith.constant 0 : i32
    return %c0_i32, %arg1 : i32, i32
  }
  func.func @transform_2(%arg0: i32, %arg1: i32) -> (i32, i32) {
    %c0_i32 = arith.constant 0 : i32
    %c0_i32_0 = arith.constant 0 : i32
    %c0_i32_1 = arith.constant 0 : i32
    return %c0_i32, %c0_i32_0 : i32, i32
  }
  func.func @transform_3(%arg0: i32, %arg1: i32) -> (i32, i32) {
    %c0_i32 = arith.constant 0 : i32
    %c0_i32_0 = arith.constant 0 : i32
    %c0_i32_1 = arith.constant 0 : i32
    return %c0_i32, %c0_i32_0 : i32, i32
  }
  func.func @transform_4(%arg0: i32, %arg1: i32) -> (i32, i32) {
    %c0_i32 = arith.constant 0 : i32
    return %arg0, %arg1 : i32, i32
  }
  func.func @transform_5(%arg0: i32, %arg1: i32) -> (i32, i32) {
    %c0_i32 = arith.constant 0 : i32
    return %arg0, %arg1 : i32, i32
  }
  func.func @transform_6(%arg0: i32, %arg1: i32) -> (i32, i32) {
    %c0_i32 = arith.constant 0 : i32
    return %arg0, %arg1 : i32, i32
  }
}

module attributes {stable_mosaic.version = 11 : i64} {
  func.func @conv_stats_kernel(%arg0: i32, %arg1: i32, %arg2: memref<128x4xbf16, #tpu.memory_space<vmem>>, %arg3: memref<4x128xbf16, #tpu.memory_space<vmem>>, %arg4: memref<128x128xbf16, #tpu.memory_space<vmem>>, %arg5: memref<8x128xf32, #tpu.memory_space<vmem>>, %arg6: memref<8x128xf32, #tpu.memory_space<vmem>>) attributes {dimension_semantics = [#tpu.dimension_semantics<parallel>, #tpu.dimension_semantics<parallel>], iteration_bounds = array<i64: 1, 1>, scalar_prefetch = 0 : i64, scratch_operands = 0 : i64, tpu.core_type = #tpu.core_type<tc>, window_params = [{transform_indices = @transform_0, window_bounds = array<i64: 128, 4>}, {transform_indices = @transform_1, window_bounds = array<i64: 4, 128>}, {transform_indices = @transform_2, window_bounds = array<i64: 128, 128>}, {transform_indices = @transform_3, window_bounds = array<i64: 8, 128>}, {transform_indices = @transform_4, window_bounds = array<i64: 8, 128>}]} {
    %c0 = arith.constant 0 : index
    %c0_0 = arith.constant 0 : index
    %0 = vector.load %arg2[%c0, %c0_0] : memref<128x4xbf16, #tpu.memory_space<vmem>>, vector<128x4xbf16>
    %c0_1 = arith.constant 0 : index
    %c0_2 = arith.constant 0 : index
    %1 = vector.load %arg3[%c0_1, %c0_2] : memref<4x128xbf16, #tpu.memory_space<vmem>>, vector<4x128xbf16>
    %cst = arith.constant dense<0.000000e+00> : vector<128x128xf32>
    %2 = tpu.matmul %0, %1, %cst {dimension_numbers = #tpu.dot_dimension_numbers<[1], [0], [0], [1], [0, 0, 1, 1], [], []>} : vector<128x4xbf16>, vector<4x128xbf16>, vector<128x128xf32> -> vector<128x128xf32>
    %3 = arith.truncf %2 : vector<128x128xf32> to vector<128x128xbf16>
    %c0_3 = arith.constant 0 : index
    %c0_4 = arith.constant 0 : index
    %4 = vector.load %arg4[%c0_3, %c0_4] : memref<128x128xbf16, #tpu.memory_space<vmem>>, vector<128x128xbf16>
    tpu.vector_store %arg4[%c0_3, %c0_4], %3 {strides = array<i32>} : memref<128x128xbf16, #tpu.memory_space<vmem>>, vector<128x128xbf16>,
    %cst_5 = arith.constant dense<0.000000e+00> : vector<128xf32>
    %5 = vector.multi_reduction <add>, %2, %cst_5 [0] : vector<128x128xf32> to vector<128xf32>
    %6 = vector.shape_cast %5 : vector<128xf32> to vector<1x128xf32>
    %7 = arith.mulf %2, %2 : vector<128x128xf32>
    %cst_6 = arith.constant dense<0.000000e+00> : vector<128xf32>
    %8 = vector.multi_reduction <add>, %7, %cst_6 [0] : vector<128x128xf32> to vector<128xf32>
    %9 = vector.shape_cast %8 : vector<128xf32> to vector<1x128xf32>
    %10 = tpu.iota {dimensions = array<i32: 0>} : vector<8x128xi32>
    %c0_i32 = arith.constant 0 : i32
    %11 = vector.broadcast %c0_i32 : i32 to vector<8x128xi32>
    %12 = arith.cmpi eq, %10, %11 : vector<8x128xi32>
    %cst_7 = arith.constant 0.000000e+00 : f32
    %13 = vector.shape_cast %6 : vector<1x128xf32> to vector<1x128xf32>
    %14 = vector.broadcast %13 : vector<1x128xf32> to vector<8x128xf32>
    %15 = vector.broadcast %cst_7 : f32 to vector<8x128xf32>
    %16 = arith.select %12, %14, %15 : vector<8x128xi1>, vector<8x128xf32>
    %c0_8 = arith.constant 0 : index
    %c0_9 = arith.constant 0 : index
    %17 = vector.load %arg5[%c0_8, %c0_9] : memref<8x128xf32, #tpu.memory_space<vmem>>, vector<8x128xf32>
    tpu.vector_store %arg5[%c0_8, %c0_9], %16 {strides = array<i32>} : memref<8x128xf32, #tpu.memory_space<vmem>>, vector<8x128xf32>,
    %c0_i32_10 = arith.constant 0 : i32
    %18 = vector.broadcast %c0_i32_10 : i32 to vector<8x128xi32>
    %19 = arith.cmpi eq, %10, %18 : vector<8x128xi32>
    %cst_11 = arith.constant 0.000000e+00 : f32
    %20 = vector.shape_cast %9 : vector<1x128xf32> to vector<1x128xf32>
    %21 = vector.broadcast %20 : vector<1x128xf32> to vector<8x128xf32>
    %22 = vector.broadcast %cst_11 : f32 to vector<8x128xf32>
    %23 = arith.select %19, %21, %22 : vector<8x128xi1>, vector<8x128xf32>
    %c0_12 = arith.constant 0 : index
    %c0_13 = arith.constant 0 : index
    %24 = vector.load %arg6[%c0_12, %c0_13] : memref<8x128xf32, #tpu.memory_space<vmem>>, vector<8x128xf32>
    tpu.vector_store %arg6[%c0_12, %c0_13], %23 {strides = array<i32>} : memref<8x128xf32, #tpu.memory_space<vmem>>, vector<8x128xf32>,
    return
  }
  func.func @transform_0(%arg0: i32, %arg1: i32) -> (i32, i32) {
    %c0_i32 = arith.constant 0 : i32
    %c0_i32_0 = arith.constant 0 : i32
    return %arg0, %c0_i32 : i32, i32
  }
  func.func @transform_1(%arg0: i32, %arg1: i32) -> (i32, i32) {
    %c0_i32 = arith.constant 0 : i32
    %c0_i32_0 = arith.constant 0 : i32
    return %c0_i32, %arg1 : i32, i32
  }
  func.func @transform_2(%arg0: i32, %arg1: i32) -> (i32, i32) {
    %c0_i32 = arith.constant 0 : i32
    return %arg0, %arg1 : i32, i32
  }
  func.func @transform_3(%arg0: i32, %arg1: i32) -> (i32, i32) {
    %c0_i32 = arith.constant 0 : i32
    return %arg0, %arg1 : i32, i32
  }
  func.func @transform_4(%arg0: i32, %arg1: i32) -> (i32, i32) {
    %c0_i32 = arith.constant 0 : i32
    return %arg0, %arg1 : i32, i32
  }
}

module attributes {stable_mosaic.version = 11 : i64} {
  func.func @tail_kernel(%arg0: i32, %arg1: memref<128x128xbf16, #tpu.memory_space<vmem>>, %arg2: memref<128x128xbf16, #tpu.memory_space<vmem>>, %arg3: memref<1x128xf32, #tpu.memory_space<vmem>>, %arg4: memref<1x128xf32, #tpu.memory_space<vmem>>, %arg5: memref<1x128xf32, #tpu.memory_space<vmem>>, %arg6: memref<1x128xf32, #tpu.memory_space<vmem>>, %arg7: memref<128x128xbf16, #tpu.memory_space<vmem>>) attributes {dimension_semantics = [#tpu.dimension_semantics<parallel>], iteration_bounds = array<i64: 1>, scalar_prefetch = 0 : i64, scratch_operands = 0 : i64, tpu.core_type = #tpu.core_type<tc>, window_params = [{transform_indices = @transform_0, window_bounds = array<i64: 128, 128>}, {transform_indices = @transform_1, window_bounds = array<i64: 128, 128>}, {pipeline_mode = #tpu.pipeline_mode<synchronous>, transform_indices = @transform_2, window_bounds = array<i64: 1, 128>}, {pipeline_mode = #tpu.pipeline_mode<synchronous>, transform_indices = @transform_3, window_bounds = array<i64: 1, 128>}, {pipeline_mode = #tpu.pipeline_mode<synchronous>, transform_indices = @transform_4, window_bounds = array<i64: 1, 128>}, {pipeline_mode = #tpu.pipeline_mode<synchronous>, transform_indices = @transform_5, window_bounds = array<i64: 1, 128>}, {transform_indices = @transform_6, window_bounds = array<i64: 128, 128>}]} {
    %c0 = arith.constant 0 : index
    %c0_0 = arith.constant 0 : index
    %0 = vector.load %arg1[%c0, %c0_0] : memref<128x128xbf16, #tpu.memory_space<vmem>>, vector<128x128xbf16>
    %1 = arith.extf %0 : vector<128x128xbf16> to vector<128x128xf32>
    %c0_1 = arith.constant 0 : index
    %c0_2 = arith.constant 0 : index
    %2 = vector.load %arg3[%c0_1, %c0_2] : memref<1x128xf32, #tpu.memory_space<vmem>>, vector<1x128xf32>
    %3 = vector.broadcast %2 : vector<1x128xf32> to vector<128x128xf32>
    %4 = arith.mulf %1, %3 : vector<128x128xf32>
    %c0_3 = arith.constant 0 : index
    %c0_4 = arith.constant 0 : index
    %5 = vector.load %arg4[%c0_3, %c0_4] : memref<1x128xf32, #tpu.memory_space<vmem>>, vector<1x128xf32>
    %6 = vector.broadcast %5 : vector<1x128xf32> to vector<128x128xf32>
    %7 = arith.addf %4, %6 : vector<128x128xf32>
    %c0_5 = arith.constant 0 : index
    %c0_6 = arith.constant 0 : index
    %8 = vector.load %arg2[%c0_5, %c0_6] : memref<128x128xbf16, #tpu.memory_space<vmem>>, vector<128x128xbf16>
    %9 = arith.extf %8 : vector<128x128xbf16> to vector<128x128xf32>
    %c0_7 = arith.constant 0 : index
    %c0_8 = arith.constant 0 : index
    %10 = vector.load %arg5[%c0_7, %c0_8] : memref<1x128xf32, #tpu.memory_space<vmem>>, vector<1x128xf32>
    %11 = vector.broadcast %10 : vector<1x128xf32> to vector<128x128xf32>
    %12 = arith.mulf %9, %11 : vector<128x128xf32>
    %c0_9 = arith.constant 0 : index
    %c0_10 = arith.constant 0 : index
    %13 = vector.load %arg6[%c0_9, %c0_10] : memref<1x128xf32, #tpu.memory_space<vmem>>, vector<1x128xf32>
    %14 = vector.broadcast %13 : vector<1x128xf32> to vector<128x128xf32>
    %15 = arith.addf %12, %14 : vector<128x128xf32>
    %16 = arith.addf %7, %15 : vector<128x128xf32>
    %cst = arith.constant 0.000000e+00 : f32
    %17 = vector.broadcast %cst : f32 to vector<128x128xf32>
    %18 = arith.maximumf %16, %17 : vector<128x128xf32>
    %19 = arith.truncf %18 : vector<128x128xf32> to vector<128x128xbf16>
    %c0_11 = arith.constant 0 : index
    %c0_12 = arith.constant 0 : index
    %20 = vector.load %arg7[%c0_11, %c0_12] : memref<128x128xbf16, #tpu.memory_space<vmem>>, vector<128x128xbf16>
    tpu.vector_store %arg7[%c0_11, %c0_12], %19 {strides = array<i32>} : memref<128x128xbf16, #tpu.memory_space<vmem>>, vector<128x128xbf16>,
    return
  }
  func.func @transform_0(%arg0: i32) -> (i32, i32) {
    %c0_i32 = arith.constant 0 : i32
    %c0_i32_0 = arith.constant 0 : i32
    return %arg0, %c0_i32 : i32, i32
  }
  func.func @transform_1(%arg0: i32) -> (i32, i32) {
    %c0_i32 = arith.constant 0 : i32
    %c0_i32_0 = arith.constant 0 : i32
    return %arg0, %c0_i32 : i32, i32
  }
  func.func @transform_2(%arg0: i32) -> (i32, i32) {
    %c0_i32 = arith.constant 0 : i32
    %c0_i32_0 = arith.constant 0 : i32
    %c0_i32_1 = arith.constant 0 : i32
    return %c0_i32, %c0_i32_0 : i32, i32
  }
  func.func @transform_3(%arg0: i32) -> (i32, i32) {
    %c0_i32 = arith.constant 0 : i32
    %c0_i32_0 = arith.constant 0 : i32
    %c0_i32_1 = arith.constant 0 : i32
    return %c0_i32, %c0_i32_0 : i32, i32
  }
  func.func @transform_4(%arg0: i32) -> (i32, i32) {
    %c0_i32 = arith.constant 0 : i32
    %c0_i32_0 = arith.constant 0 : i32
    %c0_i32_1 = arith.constant 0 : i32
    return %c0_i32, %c0_i32_0 : i32, i32
  }
  func.func @transform_5(%arg0: i32) -> (i32, i32) {
    %c0_i32 = arith.constant 0 : i32
    %c0_i32_0 = arith.constant 0 : i32
    %c0_i32_1 = arith.constant 0 : i32
    return %c0_i32, %c0_i32_0 : i32, i32
  }
  func.func @transform_6(%arg0: i32) -> (i32, i32) {
    %c0_i32 = arith.constant 0 : i32
    %c0_i32_0 = arith.constant 0 : i32
    return %arg0, %c0_i32 : i32, i32
  }
}

</mosaic_0001>

<bundles_post_ra>
// kernel: tile.13
= control target key start
LH: loop header
LB: loop body
LE: loop exit
PB: predicated region body
PF: predicated region fallthrough
CT: control target
= control target key end

     0   :  { %s28_s0 = inlined_call_operand.vmem [shape: f32[8], index: 0, kind: input, shape index: {}]   ;;  %s29_s1 = inlined_call_operand.vmem [shape: f32[9,8], index: 1, kind: output, shape index: {}]  }
   0x1   :  { %v4_v0 = vld [vmem:[%s28_s0] ss:$0 sm:$0xff] }
   0x2   :  { %5 = vst [vmem:[%s29_s1] sm:$0xff] %v4_v0  ;;  %8 = vst [vmem:[%s29_s1 + $0x8] sm:$0xff] %v4_v0 }

// kernel: tile.14
= control target key start
LH: loop header
LB: loop body
LE: loop exit
PB: predicated region body
PF: predicated region fallthrough
CT: control target
= control target key end

     0   :  { %s77_s10 = smov 64   ;;  %s78_s11 = smov 48   ;;  %vm3_vm0 = vcmask 64512   ;;  %vm9_vm1 = vcmask 589312   ;;  %vm15_vm2 = vcmask 523712   ;;  %vm21_vm3 = vcmask 458112   ;;  %s125_s0 = inlined_call_operand.vmem [shape: f32[9,8], index: 0, kind: input, shape index: {}]   ;;  %s126_s1 = inlined_call_operand.vmem [shape: f32[1,72], index: 1, kind: output, shape index: {}]  }
   0x1   :  { %v61_v0 = vld [vmem:[%s125_s0 + $0x8] sm:$0x1]   ;;  %v63_v1 = vld [vmem:[%s125_s0 + $0x6] sm:$0x1]   ;;  %v62_v2 = vld [vmem:[%s125_s0 + $0x7] sm:$0x1]  }
   0x2   :  { %7 = vrot.lane.b32.xlu0 %v61_v0, %s77_s10  ;;  %19 = vrot.lane.b32.xlu1 %v63_v1, %s78_s11  ;;  %v64_v3 = vld [vmem:[%s125_s0 + $0x5] sm:$0x1]   ;;  %v2_v4 = vld [vmem:[%s125_s0] sm:$0x1]   ;;  %s79_s18 = smov 56   ;;  %s80_s19 = smov 40  }
   0x3   :  { %4 = vst.msk [vmem:[#allocation0] sm:$0x1] %vm3_vm0, %v2_v4   ;;  %v65_v5 = vld [vmem:[%s125_s0 + $0x4] sm:$0x1]   ;;  %v66_v6 = vld [vmem:[%s125_s0 + $0x3] sm:$0x1]  }
   0x4   :  { %s81_s24 = smov 32   ;;  %s82_s25 = smov 24   ;;  %v67_v7 = vld [vmem:[%s125_s0 + $0x2] sm:$0x1]   ;;  %v68_v8 = vld [vmem:[%s125_s0 + $0x1] sm:$0x1]  }
   0x5   :  { %s83_s0 = smov 16   ;;  %s84_s30 = smov 8   ;;  %vm27_vm4 = vcmask 392512   ;;  %vm33_vm5 = vcmask 326912   ;;  %vm39_vm6 = vcmask 261312   ;;  %vm45_vm7 = vcmask 195712  }
   0x6   :  { %13 = vrot.lane.b32.xlu0 %v62_v2, %s79_s18  ;;  %25 = vrot.lane.b32.xlu1 %v64_v3, %s80_s19  ;;  %vm51_vm8 = vcmask 130112  }
   0xa   :  { %31 = vrot.lane.b32.xlu0 %v65_v5, %s81_s24  ;;  %37 = vrot.lane.b32.xlu1 %v66_v6, %s82_s25 }
   0xe   :  { %43 = vrot.lane.b32.xlu0 %v67_v7, %s83_s0  ;;  %49 = vrot.lane.b32.xlu1 %v68_v8, %s84_s30 }
  0x74   :  { %v8_v9 = vpop.permute.xlu0 %7   ;;  %v20_v10 = vpop.permute.xlu1 %19  }
  0x75   :  { %10 = vst.msk [vmem:[#allocation0] sm:$0x1] %vm9_vm1, %v8_v9  }
  0x78   :  { %v14_v11 = vpop.permute.xlu0 %13   ;;  %v26_v12 = vpop.permute.xlu1 %25  }
  0x79   :  { %16 = vst.msk [vmem:[#allocation0] sm:$0x1] %vm15_vm2, %v14_v11  }
  0x7a   :  { %22 = vst.msk [vmem:[#allocation0] sm:$0x1] %vm21_vm3, %v20_v10  }
  0x7b   :  { %28 = vst.msk [vmem:[#allocation0] sm:$0x1] %vm27_vm4, %v26_v12  }
  0x7c   :  { %v32_v13 = vpop.permute.xlu0 %31   ;;  %v38_v14 = vpop.permute.xlu1 %37  }
  0x7d   :  { %34 = vst.msk [vmem:[#allocation0] sm:$0x1] %vm33_vm5, %v32_v13  }
  0x7e   :  { %40 = vst.msk [vmem:[#allocation0] sm:$0x1] %vm39_vm6, %v38_v14  }
  0x80   :  { %v44_v15 = vpop.permute.xlu0 %43   ;;  %v50_v16 = vpop.permute.xlu1 %49  }
  0x81   :  { %46 = vst.msk [vmem:[#allocation0] sm:$0x1] %vm45_vm7, %v44_v15  }
  0x82   :  { %52 = vst.msk [vmem:[#allocation0] sm:$0x1] %vm51_vm8, %v50_v16  }
  0x89   :  { %v57_v17 = vld [vmem:[#allocation0] sm:$0x1] }
  0x8a   :  { %60 = vst [vmem:[%s126_s1] sm:$0x1] %v57_v17 }

// kernel: resblk_forward.4
= control target key start
LH: loop header
LB: loop body
LE: loop exit
PB: predicated region body
PF: predicated region fallthrough
CT: control target
= control target key end

     0   :  { %vm116_vm0 = vcmask 1041408   ;;  %vm91_vm1 = vcmask 293888   ;;  %s620_s1 = inlined_call_operand.vmem [shape: bf16[36,128], index: 1, kind: input, shape index: {}]   ;;  %s621_s0 = inlined_call_operand.vmem [shape: bf16[128,36], index: 0, kind: input, shape index: {}]   ;;  %s622_s2 = inlined_call_operand.vmem [shape: bf16[128,128], index: 2, kind: output, shape index: {0}]   ;;  %s623_s3 = inlined_call_operand.vmem [shape: f32[8,128], index: 3, kind: output, shape index: {1}]   ;;  %s624_s4 = inlined_call_operand.vmem [shape: f32[8,128], index: 4, kind: output, shape index: {2}]  }
   0x1   :  { %v513_v0 = vld [vmem:[%s620_s1 + $0x10] ss:$0 sps:$4 sm:$0x33]   ;;  %v514_v1 = vld [vmem:[%s620_s1 + $0x8] sm:$0xff]   ;;  %v516_v3 = vld [vmem:[%s621_s0] sm:$0xff]  }
   0x2   :  { %511 = vmatprep.subr.msk.bf16.mxu0 %vm116_vm0, %v513_v0  ;;  %v118_v2 = vsel %vm116_vm0, %v513_v0, 0  ;;  %512 = vmatprep.subr.msk.bf16.mxu1 %vm116_vm0, %v513_v0  ;;  %v515_v4 = vld [vmem:[%s620_s1] sm:$0xff]   ;;  %v517_v6 = vld [vmem:[%s621_s0 + $0x8] sm:$0xff]   ;;  %v518_v8 = vld [vmem:[%s621_s0 + $0x10] sm:$0xff]  }
   0x3   :  { %484 = vmatpush3.bf16.msra.mxu0 %v118_v2  ;;  %508 = vmatpush3.bf16.msra.mxu1 %v118_v2  ;;  %v520_v5 = vld [vmem:[%s621_s0 + $0x20] sm:$0xff]   ;;  %v521_v7 = vld [vmem:[%s621_s0 + $0x28] sm:$0xff]   ;;  %v522_v9 = vld [vmem:[%s621_s0 + $0x30] sm:$0xff]  }
   0x4   :  { %485 = vmatprep.subr.bf16.mxu0 %v514_v1  ;;  %506 = vmatprep.subr.bf16.mxu1 %v514_v1  ;;  %v519_v10 = vld [vmem:[%s621_s0 + $0x18] sm:$0xff]  }
   0x5   :  { %489 = vmatprep.mubr.msk.bf16.mxu0 %vm91_vm1, %v516_v3  ;;  %497 = vmatprep.mubr.msk.bf16.mxu1 %vm91_vm1, %v520_v5  ;;  %v523_v11 = vld [vmem:[%s621_s0 + $0x38] sm:$0xff]  }
   0x7   :  { %486 = vmatpush3.bf16.msra.mxu0 %v514_v1  ;;  %509 = vmatpush3.bf16.msra.mxu1 %v514_v1 }
   0x8   :  { %487 = vmatprep.subr.bf16.mxu0 %v515_v4  ;;  %507 = vmatprep.subr.bf16.mxu1 %v515_v4 }
   0xb   :  { %488 = vmatpush3.bf16.msra.mxu0 %v515_v4  ;;  %510 = vmatpush3.bf16.msra.mxu1 %v515_v4 }
   0xe   :  { %490 = vmatmul.mubr.msk.bf16.vlgmr.msra.gmra.mxu0 %vm91_vm1, %v517_v6  ;;  %498 = vmatmul.mubr.msk.bf16.vlgmr.msra.gmra.mxu1 %vm91_vm1, %v521_v7 }
   0xf   :  { %493 = vmatprep.mubr.msk.bf16.mxu0 %vm91_vm1, %v518_v8  ;;  %501 = vmatprep.mubr.msk.bf16.mxu1 %vm91_vm1, %v522_v9 }
  0x16   :  { %494 = vmatmul.mubr.msk.bf16.gmra.mxu0 %vm91_vm1, %v519_v10  ;;  %502 = vmatmul.mubr.msk.bf16.gmra.mxu1 %vm91_vm1, %v523_v11 }
  0xce   :  { %v491_v12 = vpop.f32.mrf.mxu0  ;;  %v499_v13 = vpop.f32.mrf.mxu1 }
  0xcf   :  { %v320_v29 = vmul.f32 %v491_v12, %v491_v12  ;;  %v328_v63 = vmul.f32 %v499_v13, %v499_v13 }
  0xd0   :  { %v154_v14 = vpop.f32.mrf.mxu0  ;;  %v186_v15 = vpop.f32.mrf.mxu1 }
  0xd1   :  { %v318_v20 = vmul.f32 %v154_v14, %v154_v14  ;;  %v326_v57 = vmul.f32 %v186_v15, %v186_v15 }
  0xd2   :  { %v492_v16 = vpop.f32.mrf.mxu0  ;;  %v500_v17 = vpop.f32.mrf.mxu1 }
  0xd3   :  { %v433_v18 = vpack.c.bf16 %v492_v16, %v491_v12  ;;  %v453_v19 = vpack.c.bf16 %v500_v17, %v499_v13  ;;  %v321_v34 = vmul.f32 %v492_v16, %v492_v16  ;;  %v329_v2 = vmul.f32 %v500_v17, %v500_v17 }
  0xd4   :  { %v157_v21 = vpop.f32.mrf.mxu0  ;;  %v189_v22 = vpop.f32.mrf.mxu1 }
  0xd5   :  { %465 = vst [vmem:[%s622_s2 + $0x8] sm:$0xff] %v433_v18   ;;  %v428_v23 = vpack.c.bf16 %v157_v21, %v154_v14  ;;  %v297_v24 = vadd.f32 %v157_v21, %v154_v14  ;;  %v319_v25 = vmul.f32 %v157_v21, %v157_v21  ;;  %469 = vst [vmem:[%s622_s2 + $0x28] sm:$0xff] %v453_v19   ;;  %v355_v21 = vlaneseq }
  0xd6   :  { %v448_v26 = vpack.c.bf16 %v189_v22, %v186_v15  ;;  %v495_v27 = vpop.f32.mrf.mxu0  ;;  %v503_v28 = vpop.f32.mrf.mxu1  ;;  %v327_v61 = vmul.f32 %v189_v22, %v189_v22 }
  0xd7   :  { %429 = vst [vmem:[%s622_s2] sm:$0xff] %v428_v23   ;;  %v298_v30 = vadd.f32 %v491_v12, %v297_v24  ;;  %v334_v31 = vadd.f32 %v319_v25, %v318_v20  ;;  %v324_v51 = vmul.f32 %v495_v27, %v495_v27  ;;  %v332_v11 = vmul.f32 %v503_v28, %v503_v28 }
  0xd8   :  { %468 = vst [vmem:[%s622_s2 + $0x20] sm:$0xff] %v448_v26   ;;  %v170_v32 = vpop.f32.mrf.mxu0  ;;  %v202_v33 = vpop.f32.mrf.mxu1 }
  0xd9   :  { %v335_v35 = vadd.f32 %v334_v31, %v320_v29  ;;  %v299_v36 = vadd.f32 %v492_v16, %v298_v30  ;;  %v322_v40 = vmul.f32 %v170_v32, %v170_v32  ;;  %v330_v6 = vmul.f32 %v202_v33, %v202_v33 }
  0xda   :  { %v496_v37 = vpop.f32.mrf.mxu0  ;;  %v504_v38 = vpop.f32.mrf.mxu1 }
  0xdb   :  { %v300_v39 = vadd.f32 %v299_v36, %v170_v32  ;;  %v336_v41 = vadd.f32 %v335_v35, %v321_v34  ;;  %v443_v42 = vpack.c.bf16 %v496_v37, %v495_v27  ;;  %v463_v44 = vpack.c.bf16 %v504_v38, %v503_v28 }
  0xdc   :  { %v173_v43 = vpop.f32.mrf.mxu0  ;;  %v205_v45 = vpop.f32.mrf.mxu1  ;;  %v325_v54 = vmul.f32 %v496_v37, %v496_v37  ;;  %v333_v16 = vmul.f32 %v504_v38, %v504_v38 }
  0xdd   :  { %v337_v46 = vadd.f32 %v336_v41, %v322_v40  ;;  %467 = vst [vmem:[%s622_s2 + $0x18] sm:$0xff] %v443_v42   ;;  %v438_v47 = vpack.c.bf16 %v173_v43, %v170_v32  ;;  %v301_v48 = vadd.f32 %v300_v39, %v173_v43  ;;  %v323_v49 = vmul.f32 %v173_v43, %v173_v43 }
  0xde   :  { %471 = vst [vmem:[%s622_s2 + $0x38] sm:$0xff] %v463_v44   ;;  %v458_v50 = vpack.c.bf16 %v205_v45, %v202_v33  ;;  %v331_v10 = vmul.f32 %v205_v45, %v205_v45 }
  0xdf   :  { %466 = vst [vmem:[%s622_s2 + $0x10] sm:$0xff] %v438_v47   ;;  %v302_v52 = vadd.f32 %v495_v27, %v301_v48  ;;  %v338_v53 = vadd.f32 %v337_v46, %v323_v49 }
  0xe0   :  { %470 = vst [vmem:[%s622_s2 + $0x30] sm:$0xff] %v458_v50  }
  0xe1   :  { %v303_v55 = vadd.f32 %v496_v37, %v302_v52  ;;  %v339_v56 = vadd.f32 %v338_v53, %v324_v51 }
  0xe3   :  { %v340_v58 = vadd.f32 %v339_v56, %v325_v54  ;;  %v304_v59 = vadd.f32 %v303_v55, %v186_v15 }
  0xe5   :  { %v305_v60 = vadd.f32 %v304_v59, %v189_v22  ;;  %v341_v62 = vadd.f32 %v340_v58, %v326_v57 }
  0xe7   :  { %v306_v0 = vadd.f32 %v499_v13, %v305_v60  ;;  %v342_v1 = vadd.f32 %v341_v62, %v327_v61 }
  0xe9   :  { %v343_v3 = vadd.f32 %v342_v1, %v328_v63  ;;  %v307_v4 = vadd.f32 %v500_v17, %v306_v0  ;;  %v356_v17 = vshrl.u32 %v355_v21, 7 }
  0xeb   :  { %v308_v5 = vadd.f32 %v307_v4, %v202_v33  ;;  %v344_v7 = vadd.f32 %v343_v3, %v329_v2  ;;  %vm357_vm2 = vcmp.eq.s32.totalorder %v356_v17, 0 }
  0xed   :  { %v345_v8 = vadd.f32 %v344_v7, %v330_v6  ;;  %v309_v9 = vadd.f32 %v308_v5, %v205_v45 }
  0xef   :  { %v310_v12 = vadd.f32 %v503_v28, %v309_v9  ;;  %v346_v14 = vadd.f32 %v345_v8, %v331_v10 }
  0xf1   :  { %v311_v15 = vadd.f32 %v504_v38, %v310_v12  ;;  %v347_v18 = vadd.f32 %v346_v14, %v332_v11 }
  0xf3   :  { %v312_v19 = vrot.slane %v311_v15, 4  ;;  %v348_v20 = vadd.f32 %v347_v18, %v333_v16 }
  0xf5   :  { %v313_v13 = vadd.f32 %v312_v19, %v311_v15  ;;  %v349_v22 = vrot.slane %v348_v20, 4 }
  0xf7   :  { %v314_v23 = vrot.slane %v313_v13, 2  ;;  %v350_v24 = vadd.f32 %v349_v22, %v348_v20 }
  0xf9   :  { %v315_v25 = vadd.f32 %v314_v23, %v313_v13  ;;  %v351_v26 = vrot.slane %v350_v24, 2 }
  0xfb   :  { %v316_v27 = vrot.slane %v315_v25, 1  ;;  %v352_v29 = vadd.f32 %v351_v26, %v350_v24 }
  0xfd   :  { %v317_v30 = vadd.f32 %v316_v27, %v315_v25  ;;  %v353_v31 = vrot.slane %v352_v29, 1 }
  0xff   :  { %v354_v28 = vadd.f32 %v353_v31, %v352_v29  ;;  %v358_v32 = vsel %vm357_vm2, %v317_v30, 0.0 }
 0x100   :  { %359 = vst [vmem:[%s623_s3] sm:$0xff] %v358_v32 }
 0x101   :  { %v360_v33 = vsel %vm357_vm2, %v354_v28, 0.0 }
 0x102   :  { %361 = vst [vmem:[%s624_s4] sm:$0xff] %v360_v33 }

// kernel: resblk_forward.5
= control target key start
LH: loop header
LB: loop body
LE: loop exit
PB: predicated region body
PF: predicated region fallthrough
CT: control target
= control target key end

     0   :  { %vm184_vm0 = vcmask 1043456   ;;  %vm159_vm1 = vcmask 588800   ;;  %s785_s1 = inlined_call_operand.vmem [shape: bf16[72,128], index: 1, kind: input, shape index: {}]   ;;  %s786_s0 = inlined_call_operand.vmem [shape: bf16[128,72], index: 0, kind: input, shape index: {}]   ;;  %s787_s2 = inlined_call_operand.vmem [shape: f32[1,72], index: 2, kind: input, shape index: {}]   ;;  %s788_s3 = inlined_call_operand.vmem [shape: f32[1,72], index: 3, kind: input, shape index: {}]   ;;  %s789_s4 = inlined_call_operand.vmem [shape: bf16[128,128], index: 4, kind: output, shape index: {0}]   ;;  %s790_s5 = inlined_call_operand.vmem [shape: f32[8,128], index: 5, kind: output, shape index: {1}]   ;;  %s791_s6 = inlined_call_operand.vmem [shape: f32[8,128], index: 6, kind: output, shape index: {2}]  }
   0x1   :  { %v626_v0 = vld [vmem:[%s785_s1 + $0x20] ss:$0 sps:$4 sm:$0xff]   ;;  %v627_v1 = vld [vmem:[%s785_s1 + $0x18] sm:$0xff]   ;;  %v628_v3 = vld [vmem:[%s785_s1 + $0x10] sm:$0xff]  }
   0x2   :  { %624 = vmatprep.subr.msk.bf16.mxu0 %vm184_vm0, %v626_v0  ;;  %v186_v2 = vsel %vm184_vm0, %v626_v0, 0  ;;  %625 = vmatprep.subr.msk.bf16.mxu1 %vm184_vm0, %v626_v0  ;;  %v490_v4 = vld [vmem:[%s786_s0] sm:$0xff]   ;;  %v561_v8 = vld [vmem:[%s786_s0 + $0x8] sm:$0xff]   ;;  %v562_v12 = vld [vmem:[%s786_s0 + $0x10] sm:$0xff]  }
   0x3   :  { %589 = vmatpush3.bf16.msra.mxu0 %v186_v2  ;;  %619 = vmatpush3.bf16.msra.mxu1 %v186_v2  ;;  %v491_v5 = vunpack.c.l.bf16 %v490_v4  ;;  %v492_v6 = vunpack.c.h.bf16 %v490_v4  ;;  %v681_v7 = vld [vmem:[%s787_s2] ss:$0 sm:$0xff]  ;;  %v495_v10 = vunpack.c.l.bf16 %v561_v8  ;;  %v496_v11 = vunpack.c.h.bf16 %v561_v8  ;;  %v563_v13 = vld [vmem:[%s786_s0 + $0x18] sm:$0xff]   ;;  %v629_v18 = vld [vmem:[%s785_s1 + $0x8] sm:$0xff]  }
   0x4   :  { %590 = vmatprep.subr.bf16.mxu0 %v627_v1  ;;  %615 = vmatprep.subr.bf16.mxu1 %v627_v1  ;;  %v689_v9 = vld [vmem:[%s788_s3] ss:$0 sm:$0xff]  ;;  %v499_v16 = vunpack.c.l.bf16 %v562_v12  ;;  %v500_v17 = vunpack.c.h.bf16 %v562_v12  ;;  %v503_v21 = vunpack.c.l.bf16 %v563_v13  ;;  %v504_v22 = vunpack.c.h.bf16 %v563_v13  ;;  %v565_v40 = vld [vmem:[%s786_s0 + $0x28] sm:$0xff]   ;;  %v566_v45 = vld [vmem:[%s786_s0 + $0x30] sm:$0xff]  }
   0x5   :  { %v60_v14 = vmul.f32 %v491_v5, %v681_v7  ;;  %v61_v15 = vmul.f32 %v492_v6, %v681_v7  ;;  %v62_v19 = vmul.f32 %v495_v10, %v681_v7  ;;  %v63_v20 = vmul.f32 %v496_v11, %v681_v7  ;;  %v564_v31 = vld [vmem:[%s786_s0 + $0x20] sm:$0xff]   ;;  %v567_v49 = vld [vmem:[%s786_s0 + $0x38] sm:$0xff]  }
   0x6   :  { %v64_v25 = vmul.f32 %v499_v16, %v681_v7  ;;  %v65_v26 = vmul.f32 %v500_v17, %v681_v7  ;;  %v66_v29 = vmul.f32 %v503_v21, %v681_v7  ;;  %v67_v30 = vmul.f32 %v504_v22, %v681_v7  ;;  %v630_v36 = vld [vmem:[%s785_s1] sm:$0xff]  }
   0x7   :  { %591 = vmatpush3.bf16.msra.mxu0 %v627_v1  ;;  %620 = vmatpush3.bf16.msra.mxu1 %v627_v1  ;;  %v83_v23 = vadd.f32 %v689_v9, %v60_v14  ;;  %v84_v24 = vadd.f32 %v689_v9, %v61_v15  ;;  %v85_v27 = vadd.f32 %v689_v9, %v62_v19  ;;  %v507_v44 = vunpack.c.l.bf16 %v564_v31 }
   0x8   :  { %592 = vmatprep.subr.bf16.mxu0 %v628_v3  ;;  %616 = vmatprep.subr.bf16.mxu1 %v628_v3  ;;  %v86_v28 = vadd.f32 %v689_v9, %v63_v20  ;;  %v87_v34 = vadd.f32 %v689_v9, %v64_v25  ;;  %v88_v35 = vadd.f32 %v689_v9, %v65_v26  ;;  %v508_v48 = vunpack.c.h.bf16 %v564_v31 }
   0x9   :  { %v99_v32 = vmax.f32 %v83_v23, 0.0  ;;  %v100_v33 = vmax.f32 %v84_v24, 0.0  ;;  %v101_v37 = vmax.f32 %v85_v27, 0.0  ;;  %v89_v39 = vadd.f32 %v689_v9, %v66_v29 }
   0xa   :  { %v102_v38 = vmax.f32 %v86_v28, 0.0  ;;  %v103_v42 = vmax.f32 %v87_v34, 0.0  ;;  %v104_v43 = vmax.f32 %v88_v35, 0.0  ;;  %v90_v47 = vadd.f32 %v689_v9, %v67_v30 }
   0xb   :  { %593 = vmatpush3.bf16.msra.mxu0 %v628_v3  ;;  %621 = vmatpush3.bf16.msra.mxu1 %v628_v3  ;;  %v115_v41 = vpack.c.bf16 %v100_v33, %v99_v32  ;;  %v105_v50 = vmax.f32 %v89_v39, 0.0  ;;  %v68_v51 = vmul.f32 %v507_v44, %v681_v7  ;;  %v511_v52 = vunpack.c.l.bf16 %v565_v40 }
   0xc   :  { %594 = vmatprep.subr.bf16.mxu0 %v629_v18  ;;  %617 = vmatprep.subr.bf16.mxu1 %v629_v18  ;;  %v116_v46 = vpack.c.bf16 %v102_v38, %v101_v37  ;;  %v512_v53 = vunpack.c.h.bf16 %v565_v40  ;;  %v117_v54 = vpack.c.bf16 %v104_v43, %v103_v42  ;;  %v69_v55 = vmul.f32 %v508_v48, %v681_v7 }
   0xd   :  { %598 = vmatprep.mubr.msk.bf16.mxu0 %vm159_vm1, %v115_v41  ;;  %v515_v56 = vunpack.c.l.bf16 %v566_v45  ;;  %v516_v57 = vunpack.c.h.bf16 %v566_v45  ;;  %v91_v58 = vadd.f32 %v689_v9, %v68_v51  ;;  %v70_v59 = vmul.f32 %v511_v52, %v681_v7 }
   0xe   :  { %v71_v60 = vmul.f32 %v512_v53, %v681_v7  ;;  %v519_v61 = vunpack.c.l.bf16 %v567_v49  ;;  %v92_v62 = vadd.f32 %v689_v9, %v69_v55  ;;  %v520_v1 = vunpack.c.h.bf16 %v567_v49 }
   0xf   :  { %595 = vmatpush3.bf16.msra.mxu0 %v629_v18  ;;  %622 = vmatpush3.bf16.msra.mxu1 %v629_v18  ;;  %v72_v63 = vmul.f32 %v515_v56, %v681_v7  ;;  %v73_v0 = vmul.f32 %v516_v57, %v681_v7  ;;  %v107_v2 = vmax.f32 %v91_v58, 0.0  ;;  %v93_v3 = vadd.f32 %v689_v9, %v70_v59 }
  0x10   :  { %596 = vmatprep.subr.bf16.mxu0 %v630_v36  ;;  %618 = vmatprep.subr.bf16.mxu1 %v630_v36  ;;  %v94_v4 = vadd.f32 %v689_v9, %v71_v60  ;;  %v74_v5 = vmul.f32 %v519_v61, %v681_v7  ;;  %v108_v6 = vmax.f32 %v92_v62, 0.0  ;;  %v75_v11 = vmul.f32 %v520_v1, %v681_v7 }
  0x11   :  { %v95_v8 = vadd.f32 %v689_v9, %v72_v63  ;;  %v96_v10 = vadd.f32 %v689_v9, %v73_v0  ;;  %v106_v12 = vmax.f32 %v90_v47, 0.0  ;;  %v109_v13 = vmax.f32 %v93_v3, 0.0 }
  0x12   :  { %v110_v14 = vmax.f32 %v94_v4, 0.0  ;;  %v97_v15 = vadd.f32 %v689_v9, %v74_v5  ;;  %v119_v16 = vpack.c.bf16 %v108_v6, %v107_v2  ;;  %v98_v19 = vadd.f32 %v689_v9, %v75_v11 }
  0x13   :  { %597 = vmatpush3.bf16.msra.mxu0 %v630_v36  ;;  %623 = vmatpush3.bf16.msra.mxu1 %v630_v36  ;;  %v111_v17 = vmax.f32 %v95_v8, 0.0  ;;  %v112_v18 = vmax.f32 %v96_v10, 0.0  ;;  %v118_v23 = vpack.c.bf16 %v106_v12, %v105_v50 }
  0x14   :  { %v120_v20 = vpack.c.bf16 %v110_v14, %v109_v13  ;;  %606 = vmatprep.mubr.msk.bf16.mxu1 %vm159_vm1, %v119_v16  ;;  %v113_v7 = vmax.f32 %v97_v15, 0.0  ;;  %v114_v22 = vmax.f32 %v98_v19, 0.0 }
  0x15   :  { %v121_v21 = vpack.c.bf16 %v112_v18, %v111_v17 }
  0x16   :  { %599 = vmatmul.mubr.msk.bf16.vlgmr.msra.gmra.mxu0 %vm159_vm1, %v116_v46  ;;  %607 = vmatmul.mubr.msk.bf16.vlgmr.msra.gmra.mxu1 %vm159_vm1, %v120_v20  ;;  %v122_v24 = vpack.c.bf16 %v114_v22, %v113_v7 }
  0x17   :  { %602 = vmatprep.mubr.msk.bf16.mxu0 %vm159_vm1, %v117_v54  ;;  %610 = vmatprep.mubr.msk.bf16.mxu1 %vm159_vm1, %v121_v21 }
  0x1e   :  { %603 = vmatmul.mubr.msk.bf16.gmra.mxu0 %vm159_vm1, %v118_v23  ;;  %611 = vmatmul.mubr.msk.bf16.gmra.mxu1 %vm159_vm1, %v122_v24 }
  0xd6   :  { %v600_v25 = vpop.f32.mrf.mxu0  ;;  %v608_v26 = vpop.f32.mrf.mxu1 }
  0xd7   :  { %v388_v38 = vmul.f32 %v600_v25, %v600_v25  ;;  %v396_v13 = vmul.f32 %v608_v26, %v608_v26 }
  0xd8   :  { %v222_v9 = vpop.f32.mrf.mxu0  ;;  %v254_v29 = vpop.f32.mrf.mxu1 }
  0xd9   :  { %v386_v31 = vmul.f32 %v222_v9, %v222_v9  ;;  %v394_v5 = vmul.f32 %v254_v29, %v254_v29 }
  0xda   :  { %v601_v27 = vpop.f32.mrf.mxu0  ;;  %v609_v35 = vpop.f32.mrf.mxu1 }
  0xdb   :  { %v529_v28 = vpack.c.bf16 %v601_v27, %v600_v25  ;;  %v549_v37 = vpack.c.bf16 %v609_v35, %v608_v26  ;;  %v389_v44 = vmul.f32 %v601_v27, %v601_v27  ;;  %v397_v16 = vmul.f32 %v609_v35, %v609_v35 }
  0xdc   :  { %v225_v30 = vpop.f32.mrf.mxu0  ;;  %v257_v41 = vpop.f32.mrf.mxu1 }
  0xdd   :  { %568 = vst [vmem:[%s789_s4 + $0x8] sm:$0xff] %v529_v28   ;;  %v524_v32 = vpack.c.bf16 %v225_v30, %v222_v9  ;;  %v365_v33 = vadd.f32 %v225_v30, %v222_v9  ;;  %v387_v34 = vmul.f32 %v225_v30, %v225_v30  ;;  %572 = vst [vmem:[%s789_s4 + $0x28] sm:$0xff] %v549_v37  }
  0xde   :  { %v604_v36 = vpop.f32.mrf.mxu0  ;;  %v544_v43 = vpack.c.bf16 %v257_v41, %v254_v29  ;;  %v612_v47 = vpop.f32.mrf.mxu1  ;;  %v395_v11 = vmul.f32 %v257_v41, %v257_v41 }
  0xdf   :  { %525 = vst [vmem:[%s789_s4] sm:$0xff] %v524_v32   ;;  %v366_v39 = vadd.f32 %v600_v25, %v365_v33  ;;  %v402_v40 = vadd.f32 %v387_v34, %v386_v31  ;;  %v392_v61 = vmul.f32 %v604_v36, %v604_v36  ;;  %v400_v24 = vmul.f32 %v612_v47, %v612_v47 }
  0xe0   :  { %v238_v42 = vpop.f32.mrf.mxu0  ;;  %571 = vst [vmem:[%s789_s4 + $0x20] sm:$0xff] %v544_v43   ;;  %v270_v53 = vpop.f32.mrf.mxu1  ;;  %v423_v32 = vlaneseq }
  0xe1   :  { %v403_v45 = vadd.f32 %v402_v40, %v388_v38  ;;  %v367_v46 = vadd.f32 %v601_v27, %v366_v39  ;;  %v390_v50 = vmul.f32 %v238_v42, %v238_v42  ;;  %v398_v20 = vmul.f32 %v270_v53, %v270_v53 }
  0xe2   :  { %v605_v48 = vpop.f32.mrf.mxu0  ;;  %v613_v59 = vpop.f32.mrf.mxu1 }
  0xe3   :  { %v368_v49 = vadd.f32 %v367_v46, %v238_v42  ;;  %v404_v51 = vadd.f32 %v403_v45, %v389_v44  ;;  %v539_v52 = vpack.c.bf16 %v605_v48, %v604_v36  ;;  %v559_v60 = vpack.c.bf16 %v613_v59, %v612_v47 }
  0xe4   :  { %v241_v54 = vpop.f32.mrf.mxu0  ;;  %v273_v0 = vpop.f32.mrf.mxu1  ;;  %v393_v2 = vmul.f32 %v605_v48, %v605_v48  ;;  %v401_v27 = vmul.f32 %v613_v59, %v613_v59 }
  0xe5   :  { %v405_v55 = vadd.f32 %v404_v51, %v390_v50  ;;  %570 = vst [vmem:[%s789_s4 + $0x18] sm:$0xff] %v539_v52   ;;  %v534_v56 = vpack.c.bf16 %v241_v54, %v238_v42  ;;  %v369_v57 = vadd.f32 %v368_v49, %v241_v54  ;;  %v391_v58 = vmul.f32 %v241_v54, %v241_v54 }
  0xe6   :  { %574 = vst [vmem:[%s789_s4 + $0x38] sm:$0xff] %v559_v60   ;;  %v554_v1 = vpack.c.bf16 %v273_v0, %v270_v53  ;;  %v399_v23 = vmul.f32 %v273_v0, %v273_v0 }
  0xe7   :  { %569 = vst [vmem:[%s789_s4 + $0x10] sm:$0xff] %v534_v56   ;;  %v370_v62 = vadd.f32 %v604_v36, %v369_v57  ;;  %v406_v63 = vadd.f32 %v405_v55, %v391_v58 }
  0xe8   :  { %573 = vst [vmem:[%s789_s4 + $0x30] sm:$0xff] %v554_v1  }
  0xe9   :  { %v371_v3 = vadd.f32 %v605_v48, %v370_v62  ;;  %v407_v4 = vadd.f32 %v406_v63, %v392_v61 }
  0xeb   :  { %v408_v6 = vadd.f32 %v407_v4, %v393_v2  ;;  %v372_v8 = vadd.f32 %v371_v3, %v254_v29 }
  0xed   :  { %v373_v10 = vadd.f32 %v372_v8, %v257_v41  ;;  %v409_v12 = vadd.f32 %v408_v6, %v394_v5 }
  0xef   :  { %v374_v14 = vadd.f32 %v608_v26, %v373_v10  ;;  %v410_v15 = vadd.f32 %v409_v12, %v395_v11 }
  0xf1   :  { %v411_v17 = vadd.f32 %v410_v15, %v396_v13  ;;  %v375_v18 = vadd.f32 %v609_v35, %v374_v14  ;;  %v424_v35 = vshrl.u32 %v423_v32, 7 }
  0xf3   :  { %v376_v19 = vadd.f32 %v375_v18, %v270_v53  ;;  %v412_v21 = vadd.f32 %v411_v17, %v397_v16  ;;  %vm425_vm2 = vcmp.eq.s32.totalorder %v424_v35, 0 }
  0xf5   :  { %v413_v7 = vadd.f32 %v412_v21, %v398_v20  ;;  %v377_v22 = vadd.f32 %v376_v19, %v273_v0 }
  0xf7   :  { %v378_v25 = vadd.f32 %v612_v47, %v377_v22  ;;  %v414_v9 = vadd.f32 %v413_v7, %v399_v23 }
  0xf9   :  { %v379_v28 = vadd.f32 %v613_v59, %v378_v25  ;;  %v415_v29 = vadd.f32 %v414_v9, %v400_v24 }
  0xfb   :  { %v380_v30 = vrot.slane %v379_v28, 4  ;;  %v416_v31 = vadd.f32 %v415_v29, %v401_v27 }
  0xfd   :  { %v381_v26 = vadd.f32 %v380_v30, %v379_v28  ;;  %v417_v33 = vrot.slane %v416_v31, 4 }
  0xff   :  { %v382_v34 = vrot.slane %v381_v26, 2  ;;  %v418_v36 = vadd.f32 %v417_v33, %v416_v31 }
 0x101   :  { %v383_v37 = vadd.f32 %v382_v34, %v381_v26  ;;  %v419_v38 = vrot.slane %v418_v36, 2 }
 0x103   :  { %v384_v39 = vrot.slane %v383_v37, 1  ;;  %v420_v40 = vadd.f32 %v419_v38, %v418_v36 }
 0x105   :  { %v385_v41 = vadd.f32 %v384_v39, %v383_v37  ;;  %v421_v42 = vrot.slane %v420_v40, 1 }
 0x107   :  { %v422_v43 = vadd.f32 %v421_v42, %v420_v40  ;;  %v426_v44 = vsel %vm425_vm2, %v385_v41, 0.0 }
 0x108   :  { %427 = vst [vmem:[%s790_s5] sm:$0xff] %v426_v44 }
 0x109   :  { %v428_v45 = vsel %vm425_vm2, %v422_v43, 0.0 }
 0x10a   :  { %429 = vst [vmem:[%s791_s6] sm:$0xff] %v428_v45 }

// kernel: resblk_forward.6
= control target key start
LH: loop header
LB: loop body
LE: loop exit
PB: predicated region body
PF: predicated region fallthrough
CT: control target
= control target key end

     0   :  { %vm97_vm0 = vcmask 1041408   ;;  %vm72_vm1 = vcmask 31744   ;;  %s579_s1 = inlined_call_operand.vmem [shape: bf16[4,128], index: 1, kind: input, shape index: {}]   ;;  %s580_s0 = inlined_call_operand.vmem [shape: bf16[128,4], index: 0, kind: input, shape index: {}]   ;;  %s581_s2 = inlined_call_operand.vmem [shape: bf16[128,128], index: 2, kind: output, shape index: {0}]   ;;  %s582_s3 = inlined_call_operand.vmem [shape: f32[8,128], index: 3, kind: output, shape index: {1}]   ;;  %s583_s4 = inlined_call_operand.vmem [shape: f32[8,128], index: 4, kind: output, shape index: {2}]  }
   0x1   :  { %v31_v0 = vld [vmem:[%s579_s1] sm:$0x3]  ;;  %v482_v3 = vld [vmem:[%s580_s0 + $0x8] sm:$0xff]   ;;  %v483_v4 = vld [vmem:[%s580_s0 + $0x10] sm:$0xff]  }
   0x2   :  { %479 = vmatprep.subr.msk.bf16.mxu0 %vm97_vm0, %v31_v0  ;;  %v99_v1 = vsel %vm97_vm0, %v31_v0, 0  ;;  %v481_v2 = vld [vmem:[%s580_s0] sm:$0xff]   ;;  %480 = vmatprep.subr.msk.bf16.mxu1 %vm97_vm0, %v31_v0  ;;  %v486_v6 = vld [vmem:[%s580_s0 + $0x28] sm:$0xff]   ;;  %v487_v7 = vld [vmem:[%s580_s0 + $0x30] sm:$0xff]  }
   0x3   :  { %460 = vmatpush3.bf16.msra.mxu0 %v99_v1  ;;  %478 = vmatpush3.bf16.msra.mxu1 %v99_v1  ;;  %v485_v5 = vld [vmem:[%s580_s0 + $0x20] sm:$0xff]   ;;  %v484_v8 = vld [vmem:[%s580_s0 + $0x18] sm:$0xff]  }
   0x4   :  { %461 = vmatprep.mubr.msk.bf16.mxu0 %vm72_vm1, %v481_v2  ;;  %469 = vmatprep.mubr.msk.bf16.mxu1 %vm72_vm1, %v485_v5  ;;  %v488_v9 = vld [vmem:[%s580_s0 + $0x38] sm:$0xff]  }
   0x6   :  { %462 = vmatmul.mubr.msk.bf16.vlgmr.msra.gmra.mxu0 %vm72_vm1, %v482_v3  ;;  %470 = vmatmul.mubr.msk.bf16.vlgmr.msra.gmra.mxu1 %vm72_vm1, %v486_v6 }
   0x7   :  { %465 = vmatprep.mubr.msk.bf16.mxu0 %vm72_vm1, %v483_v4  ;;  %473 = vmatprep.mubr.msk.bf16.mxu1 %vm72_vm1, %v487_v7 }
   0xe   :  { %466 = vmatmul.mubr.msk.bf16.gmra.mxu0 %vm72_vm1, %v484_v8  ;;  %474 = vmatmul.mubr.msk.bf16.gmra.mxu1 %vm72_vm1, %v488_v9 }
  0xc6   :  { %v463_v10 = vpop.f32.mrf.mxu0  ;;  %v471_v12 = vpop.f32.mrf.mxu1 }
  0xc7   :  { %v301_v24 = vmul.f32 %v463_v10, %v463_v10  ;;  %v309_v61 = vmul.f32 %v471_v12, %v471_v12 }
  0xc8   :  { %v135_v11 = vpop.f32.mrf.mxu0  ;;  %v167_v15 = vpop.f32.mrf.mxu1 }
  0xc9   :  { %v299_v17 = vmul.f32 %v135_v11, %v135_v11  ;;  %v307_v55 = vmul.f32 %v167_v15, %v167_v15 }
  0xca   :  { %v464_v13 = vpop.f32.mrf.mxu0  ;;  %v472_v21 = vpop.f32.mrf.mxu1 }
  0xcb   :  { %v411_v14 = vpack.c.bf16 %v464_v13, %v463_v10  ;;  %v431_v23 = vpack.c.bf16 %v472_v21, %v471_v12  ;;  %v302_v30 = vmul.f32 %v464_v13, %v464_v13  ;;  %v310_v0 = vmul.f32 %v472_v21, %v472_v21 }
  0xcc   :  { %v138_v16 = vpop.f32.mrf.mxu0  ;;  %v170_v27 = vpop.f32.mrf.mxu1 }
  0xcd   :  { %443 = vst [vmem:[%s581_s2 + $0x8] sm:$0xff] %v411_v14   ;;  %v406_v18 = vpack.c.bf16 %v138_v16, %v135_v11  ;;  %v278_v19 = vadd.f32 %v138_v16, %v135_v11  ;;  %v300_v20 = vmul.f32 %v138_v16, %v138_v16  ;;  %447 = vst [vmem:[%s581_s2 + $0x28] sm:$0xff] %v431_v23  }
  0xce   :  { %v467_v22 = vpop.f32.mrf.mxu0  ;;  %v426_v29 = vpack.c.bf16 %v170_v27, %v167_v15  ;;  %v475_v33 = vpop.f32.mrf.mxu1  ;;  %v308_v59 = vmul.f32 %v170_v27, %v170_v27 }
  0xcf   :  { %407 = vst [vmem:[%s581_s2] sm:$0xff] %v406_v18   ;;  %v279_v25 = vadd.f32 %v463_v10, %v278_v19  ;;  %v315_v26 = vadd.f32 %v300_v20, %v299_v17  ;;  %v305_v47 = vmul.f32 %v467_v22, %v467_v22  ;;  %v313_v9 = vmul.f32 %v475_v33, %v475_v33 }
  0xd0   :  { %v151_v28 = vpop.f32.mrf.mxu0  ;;  %446 = vst [vmem:[%s581_s2 + $0x20] sm:$0xff] %v426_v29   ;;  %v183_v39 = vpop.f32.mrf.mxu1  ;;  %v336_v18 = vlaneseq }
  0xd1   :  { %v316_v31 = vadd.f32 %v315_v26, %v301_v24  ;;  %v280_v32 = vadd.f32 %v464_v13, %v279_v25  ;;  %v303_v36 = vmul.f32 %v151_v28, %v151_v28  ;;  %v311_v4 = vmul.f32 %v183_v39, %v183_v39 }
  0xd2   :  { %v468_v34 = vpop.f32.mrf.mxu0  ;;  %v476_v45 = vpop.f32.mrf.mxu1 }
  0xd3   :  { %v281_v35 = vadd.f32 %v280_v32, %v151_v28  ;;  %v317_v37 = vadd.f32 %v316_v31, %v302_v30  ;;  %v421_v38 = vpack.c.bf16 %v468_v34, %v467_v22  ;;  %v441_v46 = vpack.c.bf16 %v476_v45, %v475_v33 }
  0xd4   :  { %v154_v40 = vpop.f32.mrf.mxu0  ;;  %v186_v50 = vpop.f32.mrf.mxu1  ;;  %v306_v52 = vmul.f32 %v468_v34, %v468_v34  ;;  %v314_v13 = vmul.f32 %v476_v45, %v476_v45 }
  0xd5   :  { %v318_v41 = vadd.f32 %v317_v37, %v303_v36  ;;  %445 = vst [vmem:[%s581_s2 + $0x18] sm:$0xff] %v421_v38   ;;  %v416_v42 = vpack.c.bf16 %v154_v40, %v151_v28  ;;  %v282_v43 = vadd.f32 %v281_v35, %v154_v40  ;;  %v304_v44 = vmul.f32 %v154_v40, %v154_v40 }
  0xd6   :  { %449 = vst [vmem:[%s581_s2 + $0x38] sm:$0xff] %v441_v46   ;;  %v436_v51 = vpack.c.bf16 %v186_v50, %v183_v39  ;;  %v312_v8 = vmul.f32 %v186_v50, %v186_v50 }
  0xd7   :  { %444 = vst [vmem:[%s581_s2 + $0x10] sm:$0xff] %v416_v42   ;;  %v283_v48 = vadd.f32 %v467_v22, %v282_v43  ;;  %v319_v49 = vadd.f32 %v318_v41, %v304_v44 }
  0xd8   :  { %448 = vst [vmem:[%s581_s2 + $0x30] sm:$0xff] %v436_v51  }
  0xd9   :  { %v284_v53 = vadd.f32 %v468_v34, %v283_v48  ;;  %v320_v54 = vadd.f32 %v319_v49, %v305_v47 }
  0xdb   :  { %v321_v56 = vadd.f32 %v320_v54, %v306_v52  ;;  %v285_v57 = vadd.f32 %v284_v53, %v167_v15 }
  0xdd   :  { %v286_v58 = vadd.f32 %v285_v57, %v170_v27  ;;  %v322_v60 = vadd.f32 %v321_v56, %v307_v55 }
  0xdf   :  { %v287_v62 = vadd.f32 %v471_v12, %v286_v58  ;;  %v323_v63 = vadd.f32 %v322_v60, %v308_v59 }
  0xe1   :  { %v324_v1 = vadd.f32 %v323_v63, %v309_v61  ;;  %v288_v2 = vadd.f32 %v472_v21, %v287_v62  ;;  %v337_v21 = vshrl.u32 %v336_v18, 7 }
  0xe3   :  { %v289_v3 = vadd.f32 %v288_v2, %v183_v39  ;;  %v325_v5 = vadd.f32 %v324_v1, %v310_v0  ;;  %vm338_vm2 = vcmp.eq.s32.totalorder %v337_v21, 0 }
  0xe5   :  { %v326_v6 = vadd.f32 %v325_v5, %v311_v4  ;;  %v290_v7 = vadd.f32 %v289_v3, %v186_v50 }
  0xe7   :  { %v291_v10 = vadd.f32 %v475_v33, %v290_v7  ;;  %v327_v11 = vadd.f32 %v326_v6, %v312_v8 }
  0xe9   :  { %v292_v14 = vadd.f32 %v476_v45, %v291_v10  ;;  %v328_v15 = vadd.f32 %v327_v11, %v313_v9 }
  0xeb   :  { %v293_v16 = vrot.slane %v292_v14, 4  ;;  %v329_v17 = vadd.f32 %v328_v15, %v314_v13 }
  0xed   :  { %v294_v12 = vadd.f32 %v293_v16, %v292_v14  ;;  %v330_v19 = vrot.slane %v329_v17, 4 }
  0xef   :  { %v295_v20 = vrot.slane %v294_v12, 2  ;;  %v331_v22 = vadd.f32 %v330_v19, %v329_v17 }
  0xf1   :  { %v296_v23 = vadd.f32 %v295_v20, %v294_v12  ;;  %v332_v24 = vrot.slane %v331_v22, 2 }
  0xf3   :  { %v297_v25 = vrot.slane %v296_v23, 1  ;;  %v333_v26 = vadd.f32 %v332_v24, %v331_v22 }
  0xf5   :  { %v298_v27 = vadd.f32 %v297_v25, %v296_v23  ;;  %v334_v28 = vrot.slane %v333_v26, 1 }
  0xf7   :  { %v335_v29 = vadd.f32 %v334_v28, %v333_v26  ;;  %v339_v30 = vsel %vm338_vm2, %v298_v27, 0.0 }
  0xf8   :  { %340 = vst [vmem:[%s582_s3] sm:$0xff] %v339_v30 }
  0xf9   :  { %v341_v31 = vsel %vm338_vm2, %v335_v29, 0.0 }
  0xfa   :  { %342 = vst [vmem:[%s583_s4] sm:$0xff] %v341_v31 }

// kernel: resblk_forward.7
= control target key start
LH: loop header
LB: loop body
LE: loop exit
PB: predicated region body
PF: predicated region fallthrough
CT: control target
= control target key end

     0   :  { %s647_s0 = inlined_call_operand.vmem [shape: bf16[128,128], index: 0, kind: input, shape index: {}]   ;;  %s648_s1 = inlined_call_operand.vmem [shape: bf16[128,128], index: 1, kind: input, shape index: {}]   ;;  %s649_s2 = inlined_call_operand.vmem [shape: f32[1,128], index: 2, kind: input, shape index: {}]   ;;  %s650_s3 = inlined_call_operand.vmem [shape: f32[1,128], index: 3, kind: input, shape index: {}]   ;;  %s651_s4 = inlined_call_operand.vmem [shape: f32[1,128], index: 4, kind: input, shape index: {}]   ;;  %s652_s5 = inlined_call_operand.vmem [shape: f32[1,128], index: 5, kind: input, shape index: {}]   ;;  %s653_s6 = inlined_call_operand.vmem [shape: bf16[128,128], index: 6, kind: output, shape index: {}]  }
   0x1   :  { %v332_v0 = vld [vmem:[%s647_s0] sm:$0xff]   ;;  %v435_v9 = vld [vmem:[%s647_s0 + $0x8] sm:$0xff]   ;;  %v436_v20 = vld [vmem:[%s647_s0 + $0x10] sm:$0xff]  }
   0x2   :  { %v497_v1 = vld [vmem:[%s649_s2] ss:$0 sm:$0xff]  ;;  %v333_v2 = vunpack.c.l.bf16 %v332_v0  ;;  %v334_v3 = vunpack.c.h.bf16 %v332_v0  ;;  %v442_v10 = vld [vmem:[%s648_s1 + $0x8] sm:$0xff]   ;;  %v337_v14 = vunpack.c.l.bf16 %v435_v9  ;;  %v338_v15 = vunpack.c.h.bf16 %v435_v9  ;;  %v443_v29 = vld [vmem:[%s648_s1 + $0x10] sm:$0xff]  }
   0x3   :  { %v364_v4 = vld [vmem:[%s648_s1] sm:$0xff]   ;;  %v369_v18 = vunpack.c.l.bf16 %v442_v10  ;;  %v370_v19 = vunpack.c.h.bf16 %v442_v10  ;;  %v341_v32 = vunpack.c.l.bf16 %v436_v20  ;;  %v342_v33 = vunpack.c.h.bf16 %v436_v20  ;;  %v437_v42 = vld [vmem:[%s647_s0 + $0x18] sm:$0xff]  }
   0x4   :  { %v505_v5 = vld [vmem:[%s651_s4] ss:$0 sm:$0xff]  ;;  %v365_v7 = vunpack.c.l.bf16 %v364_v4  ;;  %v366_v8 = vunpack.c.h.bf16 %v364_v4  ;;  %v62_v11 = vmul.f32 %v333_v2, %v497_v1  ;;  %v63_v12 = vmul.f32 %v334_v3, %v497_v1  ;;  %v444_v47 = vld [vmem:[%s648_s1 + $0x18] sm:$0xff]  }
   0x5   :  { %v510_v6 = vld [vmem:[%s650_s3] ss:$0 sm:$0xff]  ;;  %v64_v23 = vmul.f32 %v337_v14, %v497_v1  ;;  %v65_v24 = vmul.f32 %v338_v15, %v497_v1  ;;  %v142_v27 = vmul.f32 %v369_v18, %v505_v5  ;;  %v143_v28 = vmul.f32 %v370_v19, %v505_v5  ;;  %v439_v14 = vld [vmem:[%s647_s0 + $0x28] sm:$0xff]  }
   0x6   :  { %v523_v13 = vld [vmem:[%s652_s5] ss:$0 sm:$0xff]  ;;  %v140_v16 = vmul.f32 %v365_v7, %v505_v5  ;;  %v141_v17 = vmul.f32 %v366_v8, %v505_v5  ;;  %v85_v21 = vadd.f32 %v510_v6, %v62_v11  ;;  %v86_v22 = vadd.f32 %v510_v6, %v63_v12 }
   0x7   :  { %v87_v30 = vadd.f32 %v510_v6, %v64_v23  ;;  %v88_v31 = vadd.f32 %v510_v6, %v65_v24  ;;  %v165_v36 = vadd.f32 %v523_v13, %v142_v27  ;;  %v166_v37 = vadd.f32 %v523_v13, %v143_v28  ;;  %v438_v52 = vld [vmem:[%s647_s0 + $0x20] sm:$0xff]   ;;  %v446_v23 = vld [vmem:[%s648_s1 + $0x28] sm:$0xff]  }
   0x8   :  { %v163_v25 = vadd.f32 %v523_v13, %v140_v16  ;;  %v164_v26 = vadd.f32 %v523_v13, %v141_v17  ;;  %v66_v38 = vmul.f32 %v341_v32, %v497_v1  ;;  %v67_v39 = vmul.f32 %v342_v33, %v497_v1  ;;  %v445_v8 = vld [vmem:[%s648_s1 + $0x20] sm:$0xff]   ;;  %v440_v32 = vld [vmem:[%s647_s0 + $0x30] sm:$0xff]  }
   0x9   :  { %v373_v40 = vunpack.c.l.bf16 %v443_v29  ;;  %v374_v41 = vunpack.c.h.bf16 %v443_v29  ;;  %v181_v45 = vadd.f32 %v165_v36, %v87_v30  ;;  %v182_v46 = vadd.f32 %v166_v37, %v88_v31 }
   0xa   :  { %v179_v34 = vadd.f32 %v163_v25, %v85_v21  ;;  %v180_v35 = vadd.f32 %v164_v26, %v86_v22  ;;  %v89_v48 = vadd.f32 %v510_v6, %v66_v38  ;;  %v90_v49 = vadd.f32 %v510_v6, %v67_v39 }
   0xb   :  { %v144_v50 = vmul.f32 %v373_v40, %v505_v5  ;;  %v145_v51 = vmul.f32 %v374_v41, %v505_v5  ;;  %v197_v54 = vmax.f32 %v181_v45, 0.0  ;;  %v198_v55 = vmax.f32 %v182_v46, 0.0  ;;  %v447_v45 = vld [vmem:[%s648_s1 + $0x30] sm:$0xff]  }
   0xc   :  { %v195_v43 = vmax.f32 %v179_v34, 0.0  ;;  %v196_v44 = vmax.f32 %v180_v35, 0.0  ;;  %v345_v56 = vunpack.c.l.bf16 %v437_v42  ;;  %v346_v59 = vunpack.c.h.bf16 %v437_v42 }
   0xd   :  { %v167_v57 = vadd.f32 %v523_v13, %v144_v50  ;;  %v168_v58 = vadd.f32 %v523_v13, %v145_v51  ;;  %v377_v60 = vunpack.c.l.bf16 %v444_v47  ;;  %v403_v61 = vpack.c.bf16 %v198_v55, %v197_v54  ;;  %v441_v54 = vld [vmem:[%s647_s0 + $0x38] sm:$0xff]  }
   0xe   :  { %v398_v53 = vpack.c.bf16 %v196_v44, %v195_v43  ;;  %v68_v62 = vmul.f32 %v345_v56, %v497_v1  ;;  %v378_v63 = vunpack.c.h.bf16 %v444_v47  ;;  %v349_v0 = vunpack.c.l.bf16 %v438_v52 }
   0xf   :  { %v183_v2 = vadd.f32 %v167_v57, %v89_v48  ;;  %v184_v3 = vadd.f32 %v168_v58, %v90_v49  ;;  %v69_v4 = vmul.f32 %v346_v59, %v497_v1  ;;  %v146_v7 = vmul.f32 %v377_v60, %v505_v5  ;;  %449 = vst [vmem:[%s653_s6 + $0x8] sm:$0xff] %v403_v61  }
  0x10   :  { %399 = vst [vmem:[%s653_s6] sm:$0xff] %v398_v53   ;;  %v91_v9 = vadd.f32 %v510_v6, %v68_v62  ;;  %v147_v10 = vmul.f32 %v378_v63, %v505_v5  ;;  %v350_v11 = vunpack.c.h.bf16 %v438_v52  ;;  %v70_v12 = vmul.f32 %v349_v0, %v497_v1 }
  0x11   :  { %v199_v15 = vmax.f32 %v183_v2, 0.0  ;;  %v200_v16 = vmax.f32 %v184_v3, 0.0  ;;  %v92_v17 = vadd.f32 %v510_v6, %v69_v4  ;;  %v169_v18 = vadd.f32 %v523_v13, %v146_v7  ;;  %v448_v4 = vld [vmem:[%s648_s1 + $0x38] sm:$0xff]  }
  0x12   :  { %v170_v19 = vadd.f32 %v523_v13, %v147_v10  ;;  %v71_v20 = vmul.f32 %v350_v11, %v497_v1  ;;  %v93_v21 = vadd.f32 %v510_v6, %v70_v12  ;;  %v381_v22 = vunpack.c.l.bf16 %v445_v8 }
  0x13   :  { %v408_v24 = vpack.c.bf16 %v200_v16, %v199_v15  ;;  %v185_v25 = vadd.f32 %v169_v18, %v91_v9  ;;  %v382_v26 = vunpack.c.h.bf16 %v445_v8  ;;  %v353_v27 = vunpack.c.l.bf16 %v439_v14 }
  0x14   :  { %v186_v28 = vadd.f32 %v170_v19, %v92_v17  ;;  %v94_v29 = vadd.f32 %v510_v6, %v71_v20  ;;  %v148_v30 = vmul.f32 %v381_v22, %v505_v5  ;;  %v354_v31 = vunpack.c.h.bf16 %v439_v14 }
  0x15   :  { %450 = vst [vmem:[%s653_s6 + $0x10] sm:$0xff] %v408_v24   ;;  %v201_v33 = vmax.f32 %v185_v25, 0.0  ;;  %v149_v34 = vmul.f32 %v382_v26, %v505_v5  ;;  %v72_v35 = vmul.f32 %v353_v27, %v497_v1  ;;  %v385_v36 = vunpack.c.l.bf16 %v446_v23 }
  0x16   :  { %v202_v37 = vmax.f32 %v186_v28, 0.0  ;;  %v171_v38 = vadd.f32 %v523_v13, %v148_v30  ;;  %v73_v39 = vmul.f32 %v354_v31, %v497_v1  ;;  %v386_v40 = vunpack.c.h.bf16 %v446_v23 }
  0x17   :  { %v172_v41 = vadd.f32 %v523_v13, %v149_v34  ;;  %v95_v42 = vadd.f32 %v510_v6, %v72_v35  ;;  %v150_v43 = vmul.f32 %v385_v36, %v505_v5  ;;  %v357_v44 = vunpack.c.l.bf16 %v440_v32 }
  0x18   :  { %v413_v46 = vpack.c.bf16 %v202_v37, %v201_v33  ;;  %v187_v47 = vadd.f32 %v171_v38, %v93_v21  ;;  %v96_v48 = vadd.f32 %v510_v6, %v73_v39  ;;  %v151_v49 = vmul.f32 %v386_v40, %v505_v5 }
  0x19   :  { %v188_v50 = vadd.f32 %v172_v41, %v94_v29  ;;  %v173_v51 = vadd.f32 %v523_v13, %v150_v43  ;;  %v358_v52 = vunpack.c.h.bf16 %v440_v32  ;;  %v74_v53 = vmul.f32 %v357_v44, %v497_v1 }
  0x1a   :  { %451 = vst [vmem:[%s653_s6 + $0x18] sm:$0xff] %v413_v46   ;;  %v203_v55 = vmax.f32 %v187_v47, 0.0  ;;  %v174_v56 = vadd.f32 %v523_v13, %v151_v49  ;;  %v389_v57 = vunpack.c.l.bf16 %v447_v45  ;;  %v390_v58 = vunpack.c.h.bf16 %v447_v45 }
  0x1b   :  { %v204_v59 = vmax.f32 %v188_v50, 0.0  ;;  %v189_v60 = vadd.f32 %v173_v51, %v95_v42  ;;  %v75_v61 = vmul.f32 %v358_v52, %v497_v1  ;;  %v97_v62 = vadd.f32 %v510_v6, %v74_v53 }
  0x1c   :  { %v190_v63 = vadd.f32 %v174_v56, %v96_v48  ;;  %v152_v0 = vmul.f32 %v389_v57, %v505_v5  ;;  %v153_v2 = vmul.f32 %v390_v58, %v505_v5  ;;  %v361_v3 = vunpack.c.l.bf16 %v441_v54 }
  0x1d   :  { %v418_v7 = vpack.c.bf16 %v204_v59, %v203_v55  ;;  %v205_v8 = vmax.f32 %v189_v60, 0.0  ;;  %v98_v9 = vadd.f32 %v510_v6, %v75_v61  ;;  %v362_v10 = vunpack.c.h.bf16 %v441_v54 }
  0x1e   :  { %v206_v11 = vmax.f32 %v190_v63, 0.0  ;;  %v175_v12 = vadd.f32 %v523_v13, %v152_v0  ;;  %v176_v14 = vadd.f32 %v523_v13, %v153_v2  ;;  %v76_v15 = vmul.f32 %v361_v3, %v497_v1 }
  0x1f   :  { %452 = vst [vmem:[%s653_s6 + $0x20] sm:$0xff] %v418_v7   ;;  %v77_v16 = vmul.f32 %v362_v10, %v497_v1  ;;  %v393_v17 = vunpack.c.l.bf16 %v448_v4  ;;  %v394_v18 = vunpack.c.h.bf16 %v448_v4 }
  0x20   :  { %v423_v19 = vpack.c.bf16 %v206_v11, %v205_v8  ;;  %v191_v20 = vadd.f32 %v175_v12, %v97_v62  ;;  %v192_v21 = vadd.f32 %v176_v14, %v98_v9  ;;  %v99_v22 = vadd.f32 %v510_v6, %v76_v15 }
  0x21   :  { %v100_v23 = vadd.f32 %v510_v6, %v77_v16  ;;  %v154_v24 = vmul.f32 %v393_v17, %v505_v5  ;;  %v155_v25 = vmul.f32 %v394_v18, %v505_v5 }
  0x22   :  { %453 = vst [vmem:[%s653_s6 + $0x28] sm:$0xff] %v423_v19   ;;  %v207_v26 = vmax.f32 %v191_v20, 0.0  ;;  %v208_v27 = vmax.f32 %v192_v21, 0.0 }
  0x23   :  { %v177_v1 = vadd.f32 %v523_v13, %v154_v24  ;;  %v178_v28 = vadd.f32 %v523_v13, %v155_v25 }
  0x24   :  { %v428_v29 = vpack.c.bf16 %v208_v27, %v207_v26 }
  0x25   :  { %v193_v30 = vadd.f32 %v177_v1, %v99_v22  ;;  %v194_v31 = vadd.f32 %v178_v28, %v100_v23 }
  0x26   :  { %454 = vst [vmem:[%s653_s6 + $0x30] sm:$0xff] %v428_v29  }
  0x27   :  { %v209_v6 = vmax.f32 %v193_v30, 0.0  ;;  %v210_v32 = vmax.f32 %v194_v31, 0.0 }
  0x29   :  { %v433_v5 = vpack.c.bf16 %v210_v32, %v209_v6 }
  0x2b   :  { %455 = vst [vmem:[%s653_s6 + $0x38] sm:$0xff] %v433_v5  }

</bundles_post_ra>
